<compile_context>
chip_gen: v7x
topology: tpu7x:2x2x1
jax: 0.10.0
libtpu: 0.0.40
codegen_flags: <defaults>
</compile_context>

<pallas_src>
import functools

import jax
import jax.numpy as jnp
from jax.experimental import pallas as pl
from jax.experimental.pallas import tpu as pltpu

LANE = 128      # vreg lane width (last dim)
SUBLANE = 8     # f32 sublane count (second-to-last dim)


def _round_up(v, m):
    return (v + m - 1) // m * m


def _mlp_kernel(x_ref, w1_ref, b1_ref, w2_ref, b2_ref, wo_ref, bo_ref, o_ref):
    # Hidden layer 1: Linear (bf16 MXU, f32 accumulate) -> Dropout(p=0)=identity -> ReLU
    h = jnp.dot(x_ref[...].astype(jnp.bfloat16), w1_ref[...],
                preferred_element_type=jnp.float32)
    h = jnp.maximum(h + b1_ref[...], 0.0)
    # Hidden layer 2: Linear -> ReLU
    h = jnp.dot(h.astype(jnp.bfloat16), w2_ref[...],
                preferred_element_type=jnp.float32)
    h = jnp.maximum(h + b2_ref[...], 0.0)
    # Output projection + exact sigmoid (exp -> EUP; one f32 divide, not the bottleneck).
    z = jnp.dot(h.astype(jnp.bfloat16), wo_ref[...],
                preferred_element_type=jnp.float32)
    z = z + bo_ref[...]
    o_ref[...] = (1.0 / (1.0 + jnp.exp(-z))).astype(o_ref.dtype)


def prepare_params(w1, b1, w2, b2, wo, bo):
    """Lane-pad hidden/output feature dims to multiples of 128 ONCE (not per call).

    Padding is exact: padded hidden units have zero in/out weights and zero bias
    (ReLU(0)=0), padded output columns are sliced off in the wrapper (only if needed).
    The embed dim E is deliberately NOT padded -- x and w1's K dim stay full-extent.
    Returns (padded_params, true_output_dim).
    """
    M = w1.shape[1]
    O = wo.shape[1]
    Mp = _round_up(M, LANE)
    Op = _round_up(O, LANE)
    if Mp != M:
        w1 = jnp.pad(w1, ((0, 0), (0, Mp - M)))
        b1 = jnp.pad(b1, ((0, 0), (0, Mp - M)))
        w2 = jnp.pad(w2, ((0, Mp - M), (0, Mp - M)))
        b2 = jnp.pad(b2, ((0, 0), (0, Mp - M)))
        wo = jnp.pad(wo, ((0, Mp - M), (0, 0)))
    if Op != O:
        wo = jnp.pad(wo, ((0, 0), (0, Op - O)))
        bo = jnp.pad(bo, ((0, 0), (0, Op - O)))
    return (w1, b1, w2, b2, wo, bo), O


def _resident_spec(a):
    """Full-array, constant-index block: DMA'd once, VMEM-resident across batch tiles.

    Single-buffered (Buffered(1)) so large weights are not pointlessly double-buffered
    (halves resident weight VMEM -- matters for big middle_dim on v7x's 64 MiB VMEM).
    """
    idx = lambda i: (0, 0)
    try:
        return pl.BlockSpec(a.shape, idx, pipeline_mode=pl.Buffered(1))
    except (TypeError, AttributeError):
        # Older jax without pipeline_mode / Buffered: plain constant-index spec.
        return pl.BlockSpec(a.shape, idx)


def img2text_forward(x, w1, b1, w2, b2, wo, bo, *, output_dim=None, block_batch=512):
    """Fused Img2text MLP forward.

    x:  (B, E)   bf16 preferred (f32 also accepted)
    w1: (E, Mp)  bf16    b1: (1, Mp) f32   -- feature dims pre-padded by prepare_params()
    w2: (Mp, Mp) bf16    b2: (1, Mp) f32
    wo: (Mp, Op) bf16    bo: (1, Op) f32
    Returns (B, output_dim) f32.  Computes x @ W + b (== PyTorch x @ W_pt.T + b).
    """
    B, E = x.shape
    Mp = w1.shape[1]
    Op = wo.shape[1]
    O = Op if output_dim is None else output_dim

    # Batch tile: as large as block_batch (amortizes the ~0.35 us per-grid-step overhead
    # and fills the MXU M dim), but capped so the grid stays >= 2 -> the "parallel"
    # batch axis can still shard across v7x's two TensorCores for small B.
    tm = max(SUBLANE, min(block_batch, _round_up(pl.cdiv(B, 2), SUBLANE)))
    grid = (pl.cdiv(B, tm),)

    # ---- VMEM budget -> vmem_limit_bytes (per-generation capacity, with headroom) ----
    xb = x.dtype.itemsize
    weight_bytes = sum(a.size * a.dtype.itemsize for a in (w1, b1, w2, b2, wo, bo))
    budget = (2 * tm * E * xb          # double-buffered x tiles
              + 2 * tm * Op * 4        # double-buffered f32 out tiles
              + weight_bytes           # single-buffered resident weights/biases
              + 2 * tm * Mp * 4)       # headroom for f32 hidden activations/temporaries
    try:
        phys = pltpu.get_tpu_info().vmem_capacity_bytes   # 64 MiB v7x, 128 MiB v5e/v6e
    except Exception:
        phys = 64 << 20                                   # conservative (v7x per-core)
    vmem_limit = int(min(max(budget + (8 << 20), 32 << 20), phys - (8 << 20)))

    # Advisory cost estimate for XLA's scheduler.
    flops = 2 * B * (E * Mp + Mp * Mp + Mp * Op)
    bytes_accessed = x.size * xb + weight_bytes + B * Op * 4
    cost = pl.CostEstimate(flops=flops, transcendentals=B * Op,
                           bytes_accessed=bytes_accessed)

    out = pl.pallas_call(
        _mlp_kernel,
        out_shape=jax.ShapeDtypeStruct((B, Op), jnp.float32),
        grid=grid,
        in_specs=[
            # x: batch-tiled; last dim = full (unpadded) E -> exempt from the 128 rule.
            pl.BlockSpec((tm, E), lambda i: (i, 0)),
            _resident_spec(w1), _resident_spec(b1),
            _resident_spec(w2), _resident_spec(b2),
            _resident_spec(wo), _resident_spec(bo),
        ],
        # Op is a 128-multiple -> unmasked, lane-dense output stores.
        out_specs=pl.BlockSpec((tm, Op), lambda i: (i, 0)),
        compiler_params=pltpu.CompilerParams(
            # Batch axis is independent -> megacore sharding on v7x's 2 TensorCores.
            dimension_semantics=("parallel",),
            vmem_limit_bytes=vmem_limit,
        ),
        cost_estimate=cost,
    )(x, w1, b1, w2, b2, wo, bo)

    # No extra HBM pass when the output width needed no padding.
    return out if Op == O else out[:, :O]


def init_params(key, embed_dim, middle_dim, output_dim):
    """Deterministic synthetic init (mimics nn.Linear uniform fan-in scaling).
    Weights stored in bf16 (MXU-native), biases in f32, laid out (in, out)."""
    ks = jax.random.split(key, 6)

    def lin(kw, kb, fan_in, fan_out):
        bound = 1.0 / jnp.sqrt(fan_in)
        w = jax.random.uniform(kw, (fan_in, fan_out), jnp.float32, -bound, bound)
        b = jax.random.uniform(kb, (1, fan_out), jnp.float32, -bound, bound)
        return w.astype(jnp.bfloat16), b

    w1, b1 = lin(ks[0], ks[1], embed_dim, middle_dim)
    w2, b2 = lin(ks[2], ks[3], middle_dim, middle_dim)
    wo, bo = lin(ks[4], ks[5], middle_dim, output_dim)
    return w1, b1, w2, b2, wo, bo


def reference_forward(x, w1, b1, w2, b2, wo, bo):
    """Pure-JAX reference with the same bf16-matmul / f32-accumulate numerics."""
    h = jnp.dot(x.astype(jnp.bfloat16), w1, preferred_element_type=jnp.float32) + b1
    h = jnp.maximum(h, 0.0)
    h = jnp.dot(h.astype(jnp.bfloat16), w2, preferred_element_type=jnp.float32) + b2
    h = jnp.maximum(h, 0.0)
    z = jnp.dot(h.astype(jnp.bfloat16), wo, preferred_element_type=jnp.float32) + bo
    return jax.nn.sigmoid(z)


if __name__ == "__main__":
    # Small shapes consistent with the module (embed/middle/output scaled down from
    # 768/768/512, kept as 128-lane multiples); batch spans two 128-row tiles so the
    # grid is (2,) and both TensorCores are exercised on v7x.
    batch = 256
    embed_dim = 256
    middle_dim = 256
    output_dim = 128

    key = jax.random.PRNGKey(0)
    kx, kp = jax.random.split(key)
    # bf16 activations at the call boundary: halves x's HBM traffic vs f32.
    x = jax.random.normal(kx, (batch, embed_dim), jnp.float32).astype(jnp.bfloat16)

    raw_params = init_params(kp, embed_dim, middle_dim, output_dim)
    padded_params, out_dim = prepare_params(*raw_params)   # done once, outside forward

    fwd = jax.jit(functools.partial(img2text_forward, output_dim=out_dim))
    out = fwd(x, *padded_params)
    out = jax.block_until_ready(out)

    ref = reference_forward(x, *raw_params)
    assert out.shape == (batch, output_dim)
    max_err = float(jnp.max(jnp.abs(out - ref)))
    # Exact sigmoid epilogue -> only bf16-matmul accumulation-order differences remain.
    assert max_err < 2e-3, f"mismatch vs JAX reference: max abs err = {max_err}"

    print("KERNEL_OK")
</pallas_src>

<mosaic_0001>
module attributes {stable_mosaic.version = 11 : i64} {
  func.func @_mlp_kernel(%arg0: i32, %arg1: memref<128x256xbf16, #tpu.memory_space<vmem>>, %arg2: memref<256x256xbf16, #tpu.memory_space<vmem>>, %arg3: memref<1x256xf32, #tpu.memory_space<vmem>>, %arg4: memref<256x256xbf16, #tpu.memory_space<vmem>>, %arg5: memref<1x256xf32, #tpu.memory_space<vmem>>, %arg6: memref<256x128xbf16, #tpu.memory_space<vmem>>, %arg7: memref<1x128xf32, #tpu.memory_space<vmem>>, %arg8: memref<128x128xf32, #tpu.memory_space<vmem>>) attributes {dimension_semantics = [#tpu.dimension_semantics<parallel>], iteration_bounds = array<i64: 2>, scalar_prefetch = 0 : i64, scratch_operands = 0 : i64, tpu.core_type = #tpu.core_type<tc>, window_params = [{transform_indices = @transform_0, window_bounds = array<i64: 128, 256>}, {pipeline_mode = #tpu.pipeline_mode<synchronous>, transform_indices = @transform_1, window_bounds = array<i64: 256, 256>}, {pipeline_mode = #tpu.pipeline_mode<synchronous>, transform_indices = @transform_2, window_bounds = array<i64: 1, 256>}, {pipeline_mode = #tpu.pipeline_mode<synchronous>, transform_indices = @transform_3, window_bounds = array<i64: 256, 256>}, {pipeline_mode = #tpu.pipeline_mode<synchronous>, transform_indices = @transform_4, window_bounds = array<i64: 1, 256>}, {pipeline_mode = #tpu.pipeline_mode<synchronous>, transform_indices = @transform_5, window_bounds = array<i64: 256, 128>}, {pipeline_mode = #tpu.pipeline_mode<synchronous>, transform_indices = @transform_6, window_bounds = array<i64: 1, 128>}, {transform_indices = @transform_7, window_bounds = array<i64: 128, 128>}]} {
    %c0 = arith.constant 0 : index
    %c0_0 = arith.constant 0 : index
    %0 = vector.load %arg1[%c0, %c0_0] : memref<128x256xbf16, #tpu.memory_space<vmem>>, vector<128x256xbf16>
    %c0_1 = arith.constant 0 : index
    %c0_2 = arith.constant 0 : index
    %1 = vector.load %arg2[%c0_1, %c0_2] : memref<256x256xbf16, #tpu.memory_space<vmem>>, vector<256x256xbf16>
    %cst = arith.constant dense<0.000000e+00> : vector<128x256xf32>
    %2 = tpu.matmul %0, %1, %cst {dimension_numbers = #tpu.dot_dimension_numbers<[1], [0], [0], [1], [0, 0, 1, 1], [], []>} : vector<128x256xbf16>, vector<256x256xbf16>, vector<128x256xf32> -> vector<128x256xf32>
    %c0_3 = arith.constant 0 : index
    %c0_4 = arith.constant 0 : index
    %3 = vector.load %arg3[%c0_3, %c0_4] : memref<1x256xf32, #tpu.memory_space<vmem>>, vector<1x256xf32>
    %4 = vector.broadcast %3 : vector<1x256xf32> to vector<128x256xf32>
    %5 = arith.addf %2, %4 : vector<128x256xf32>
    %cst_5 = arith.constant 0.000000e+00 : f32
    %6 = vector.broadcast %cst_5 : f32 to vector<128x256xf32>
    %7 = arith.maximumf %5, %6 : vector<128x256xf32>
    %8 = arith.truncf %7 : vector<128x256xf32> to vector<128x256xbf16>
    %c0_6 = arith.constant 0 : index
    %c0_7 = arith.constant 0 : index
    %9 = vector.load %arg4[%c0_6, %c0_7] : memref<256x256xbf16, #tpu.memory_space<vmem>>, vector<256x256xbf16>
    %cst_8 = arith.constant dense<0.000000e+00> : vector<128x256xf32>
    %10 = tpu.matmul %8, %9, %cst_8 {dimension_numbers = #tpu.dot_dimension_numbers<[1], [0], [0], [1], [0, 0, 1, 1], [], []>} : vector<128x256xbf16>, vector<256x256xbf16>, vector<128x256xf32> -> vector<128x256xf32>
    %c0_9 = arith.constant 0 : index
    %c0_10 = arith.constant 0 : index
    %11 = vector.load %arg5[%c0_9, %c0_10] : memref<1x256xf32, #tpu.memory_space<vmem>>, vector<1x256xf32>
    %12 = vector.broadcast %11 : vector<1x256xf32> to vector<128x256xf32>
    %13 = arith.addf %10, %12 : vector<128x256xf32>
    %cst_11 = arith.constant 0.000000e+00 : f32
    %14 = vector.broadcast %cst_11 : f32 to vector<128x256xf32>
    %15 = arith.maximumf %13, %14 : vector<128x256xf32>
    %16 = arith.truncf %15 : vector<128x256xf32> to vector<128x256xbf16>
    %c0_12 = arith.constant 0 : index
    %c0_13 = arith.constant 0 : index
    %17 = vector.load %arg6[%c0_12, %c0_13] : memref<256x128xbf16, #tpu.memory_space<vmem>>, vector<256x128xbf16>
    %cst_14 = arith.constant dense<0.000000e+00> : vector<128x128xf32>
    %18 = tpu.matmul %16, %17, %cst_14 {dimension_numbers = #tpu.dot_dimension_numbers<[1], [0], [0], [1], [0, 0, 1, 1], [], []>} : vector<128x256xbf16>, vector<256x128xbf16>, vector<128x128xf32> -> vector<128x128xf32>
    %c0_15 = arith.constant 0 : index
    %c0_16 = arith.constant 0 : index
    %19 = vector.load %arg7[%c0_15, %c0_16] : memref<1x128xf32, #tpu.memory_space<vmem>>, vector<1x128xf32>
    %20 = vector.broadcast %19 : vector<1x128xf32> to vector<128x128xf32>
    %21 = arith.addf %18, %20 : vector<128x128xf32>
    %cst_17 = arith.constant 0.000000e+00 : f32
    %22 = vector.broadcast %cst_17 : f32 to vector<128x128xf32>
    %23 = arith.subf %22, %21 : vector<128x128xf32>
    %24 = math.exp %23 : vector<128x128xf32>
    %cst_18 = arith.constant 1.000000e+00 : f32
    %25 = vector.broadcast %cst_18 : f32 to vector<128x128xf32>
    %26 = arith.addf %25, %24 : vector<128x128xf32>
    %cst_19 = arith.constant 1.000000e+00 : f32
    %27 = vector.broadcast %cst_19 : f32 to vector<128x128xf32>
    %28 = arith.divf %27, %26 : vector<128x128xf32>
    %c0_20 = arith.constant 0 : index
    %c0_21 = arith.constant 0 : index
    %29 = vector.load %arg8[%c0_20, %c0_21] : memref<128x128xf32, #tpu.memory_space<vmem>>, vector<128x128xf32>
    tpu.vector_store %arg8[%c0_20, %c0_21], %28 {strides = array<i32>} : memref<128x128xf32, #tpu.memory_space<vmem>>, vector<128x128xf32>,
    return
  }
  func.func @transform_0(%arg0: i32) -> (i32, i32) {
    %c0_i32 = arith.constant 0 : i32
    %c0_i32_0 = arith.constant 0 : i32
    return %arg0, %c0_i32 : i32, i32
  }
  func.func @transform_1(%arg0: i32) -> (i32, i32) {
    %c0_i32 = arith.constant 0 : i32
    %c0_i32_0 = arith.constant 0 : i32
    %c0_i32_1 = arith.constant 0 : i32
    return %c0_i32, %c0_i32_0 : i32, i32
  }
  func.func @transform_2(%arg0: i32) -> (i32, i32) {
    %c0_i32 = arith.constant 0 : i32
    %c0_i32_0 = arith.constant 0 : i32
    %c0_i32_1 = arith.constant 0 : i32
    return %c0_i32, %c0_i32_0 : i32, i32
  }
  func.func @transform_3(%arg0: i32) -> (i32, i32) {
    %c0_i32 = arith.constant 0 : i32
    %c0_i32_0 = arith.constant 0 : i32
    %c0_i32_1 = arith.constant 0 : i32
    return %c0_i32, %c0_i32_0 : i32, i32
  }
  func.func @transform_4(%arg0: i32) -> (i32, i32) {
    %c0_i32 = arith.constant 0 : i32
    %c0_i32_0 = arith.constant 0 : i32
    %c0_i32_1 = arith.constant 0 : i32
    return %c0_i32, %c0_i32_0 : i32, i32
  }
  func.func @transform_5(%arg0: i32) -> (i32, i32) {
    %c0_i32 = arith.constant 0 : i32
    %c0_i32_0 = arith.constant 0 : i32
    %c0_i32_1 = arith.constant 0 : i32
    return %c0_i32, %c0_i32_0 : i32, i32
  }
  func.func @transform_6(%arg0: i32) -> (i32, i32) {
    %c0_i32 = arith.constant 0 : i32
    %c0_i32_0 = arith.constant 0 : i32
    %c0_i32_1 = arith.constant 0 : i32
    return %c0_i32, %c0_i32_0 : i32, i32
  }
  func.func @transform_7(%arg0: i32) -> (i32, i32) {
    %c0_i32 = arith.constant 0 : i32
    %c0_i32_0 = arith.constant 0 : i32
    return %arg0, %c0_i32 : i32, i32
  }
}

</mosaic_0001>

<bundles_post_ra>
// kernel: img2text_forward.1
= control target key start
LH: loop header
LB: loop body
LE: loop exit
PB: predicated region body
PF: predicated region fallthrough
CT: control target
= control target key end

     0   :  { %12 = vsyncpa [#allocation3], 0  ;;  %s2800_s0 = inlined_call_operand.hbm [shape: bf16[256,256], index: 0, kind: input, shape index: {}]   ;;  %s2801_s1 = inlined_call_operand.hbm [shape: bf16[256,256], index: 1, kind: input, shape index: {}]   ;;  %s2802_s2 = inlined_call_operand.vmem [shape: f32[1,256], index: 2, kind: input, shape index: {}]   ;;  %s2803_s3 = inlined_call_operand.hbm [shape: bf16[256,256], index: 3, kind: input, shape index: {}]   ;;  %s2804_s4 = inlined_call_operand.vmem [shape: f32[1,256], index: 4, kind: input, shape index: {}]   ;;  %s2805_s5 = inlined_call_operand.hbm [shape: bf16[256,128], index: 5, kind: input, shape index: {}]   ;;  %s2806_s6 = inlined_call_operand.vmem [shape: f32[1,128], index: 6, kind: input, shape index: {}]   ;;  %s2807_s7 = inlined_call_operand.hbm [shape: f32[256,128], index: 7, kind: output, shape index: {}]  }
   0x1   :  { %14 = vsyncpa [#allocation3 + $0x1], 0 }
   0x2   :  { %15 = vsyncpa [#allocation6], 0 }
   0x3   :  { %16 = vsyncpa [#allocation9], 0 }
   0x4   :  { %17 = vsyncpa [#allocation4], 0 }
   0x5   :  { %19 = vsyncpa [#allocation4 + $0x1], 0  ;;  %s2356_s24 = smov 0   ;;  %s2358_s25 = smov 0  }
   0x6   :  { %s2360_s26 = smov 0   ;;  %s2362_s27 = smov 0  }
   0x7 LB: > { %s2377_s28 = sadd.s32 4294967295, %s2303_s27   ;;  %s1631_s29 = sadd.s32 4294967294, %s2303_s27   ;;  %s2303_s27 = sphi %s2362_s27, %s2833_s27   ;;  %s2299_s26 = sphi %s2360_s26, %s2832_s26   ;;  %s2295_s25 = sphi %s2358_s25, %s2831_s25   ;;  %s2291_s24 = sphi %s2356_s24, %s2830_s24  }
   0x8   : > { %p45_p0 = scmp.ne.s32.totalorder %s2295_s25, %s2291_s24  ;;  %p2808_p1 = scmp.eq.s32.totalorder %s2377_s28, 0 }
   0x9   : > { %p201_p3 = scmp.eq.s32.totalorder %s1631_s29, 1  ;;  %p1632_p5 = scmp.ge.s32.totalorder %s2303_s27, 1 }
   0xa   : > { %p2386_p4 = por %p2808_p1, %p45_p0  ;;  %p208_p7 = scmp.lt.s32.totalorder %s2303_s27, 3 }
   0xb   : > { %p2391_p6 = por %p201_p3, %p45_p0  ;;  %s2305_s10 = smov [#allocation5]  }
   0xc   : > { %s2812_s30 = scalar_select %p2386_p4, 1, 0 }
   0xd   : > { %s2813_s8 = scalar_select %p2391_p6, 1, 0 }
   0xe   : > { %p2396_p8 = pnand %p1632_p5, %p208_p7  ;;  %s220_s11 = sshll.u32 %s2305_s10, 4  ;;  %s2400_s11 = int_to_ptr.vmem [resolvable:$true] %s220_s11 }
   0xf   : > { %2814 = sst [smem:[#allocation15_spill]] %s2813_s8  ;;  %s2306_s13 = smov [#allocation7]  }
  0x10   : > { %s2815_s9 = scalar_select %p2396_p8, 1, 0 }
  0x11   : > { %p1848_p9 = pneg %p2396_p8  ;;  %s236_s14 = sshll.u32 %s2306_s13, 4  ;;  %s2411_s14 = int_to_ptr.vmem [resolvable:$true] %s236_s14 }
  0x12   : > { %s2307_s15 = smov [#allocation8]   ;;  %s2115_s19 = scalar_lea.hbm %s2801_s1, 4096 }
  0x13   : > { %p2407_p11 = pnand %p1848_p9, %p2808_p1  ;;  %s2413_s16 = sshll.u32 %s2307_s15, 4  ;;  %s253_s16 = int_to_ptr.vmem [resolvable:$true] %s2413_s16 }
  0x14   : > { %p2116_p12 = scmp.ne.s32.totalorder %s2801_s1, %s2115_s19  ;;  %p2122_p5 = scmp.lt.u32.totalorder %s2115_s19, %s2801_s1 }
  0x15   : > { %p2423_p13 = pneg %p2407_p11 }
  0x17   : > { %p2118_p0 = pnand %p2423_p13, %p2116_p12 }
  0x19   : > { %p2119_p3 = pneg %p2118_p0 }
  0x1b   : > { %p2124_p7 = pnand %p2122_p5, %p2119_p3 }
  0x1d   : > { %2127 = shalt.err (!%p2124_p7)
}
  0x1e   : > { %s2128_s10 = scalar_lea.vmem %s2400_s11, 4096  ;;  %p2136_p2 = scmp.lt.s32.totalorder %s2400_s11, %s2400_s11 }
  0x1f   : > { %p2129_p9 = scmp.ne.s32.totalorder %s2400_s11, %s2128_s10  ;;  %p2137_p6 = scmp.lt.s32.totalorder %s2128_s10, %s2128_s10 }
  0x21   : > { %p2131_p10 = pnand %p2129_p9, %p2423_p13  ;;  %p2138_p12 = por %p2137_p6, %p2136_p2 }
  0x23   : > { %p2132_p1 = pneg %p2131_p10 }
  0x25   : > { %p2139_p0 = pnand %p2138_p12, %p2132_p1 }
  0x27   : > { %2142 = shalt.err (!%p2139_p0)
}
  0x28   : > { %s2308_s13 = smov 128   ;;  %s2309_s15 = smov 8  }
  0x29   : > { %1851 = dma.hbm_to_vmem [thread:$0]  (!%p2407_p11), %s2801_s1, 4096, %s2400_s11, [#allocation6], %s2308_s13, %s2308_s13, %s2309_s15  }
  0x2a   : > { %s2143_s21 = scalar_lea.hbm %s2803_s3, 4096 }
  0x2b   : > { %p2144_p1 = scmp.ne.s32.totalorder %s2803_s3, %s2143_s21  ;;  %p2150_p10 = scmp.lt.u32.totalorder %s2143_s21, %s2803_s3 }
  0x2d   : > { %p2146_p2 = pnand %p2144_p1, %p2423_p13 }
  0x2f   : > { %p2147_p6 = pneg %p2146_p2 }
  0x31   : > { %p2152_p3 = pnand %p2150_p10, %p2147_p6 }
  0x33   : > { %2155 = shalt.err (!%p2152_p3)
}
  0x34   : > { %s2156_s11 = scalar_lea.vmem %s2411_s14, 4096  ;;  %p2164_p12 = scmp.lt.s32.totalorder %s2411_s14, %s2411_s14 }
  0x35   : > { %p2157_p5 = scmp.ne.s32.totalorder %s2411_s14, %s2156_s11  ;;  %p2165_p0 = scmp.lt.s32.totalorder %s2156_s11, %s2156_s11 }
  0x37   : > { %p2159_p7 = pnand %p2157_p5, %p2423_p13  ;;  %p2166_p1 = por %p2165_p0, %p2164_p12 }
  0x39   : > { %p2160_p9 = pneg %p2159_p7 }
  0x3b   : > { %p2167_p2 = pnand %p2166_p1, %p2160_p9 }
  0x3d   : > { %2170 = shalt.err (!%p2167_p2)
}
  0x3e   : > { %1854 = dma.hbm_to_vmem [thread:$0]  (!%p2407_p11), %s2803_s3, 4096, %s2411_s14, [#allocation6], %s2308_s13, %s2308_s13, %s2309_s15  }
  0x3f   : > { %s2171_s20 = scalar_lea.hbm %s2805_s5, 2048 }
  0x40   : > { %p2172_p6 = scmp.ne.s32.totalorder %s2805_s5, %s2171_s20  ;;  %p2178_p5 = scmp.lt.u32.totalorder %s2171_s20, %s2805_s5 }
  0x42   : > { %p2174_p10 = pnand %p2172_p6, %p2423_p13 }
  0x44   : > { %p2175_p3 = pneg %p2174_p10 }
  0x46   : > { %p2180_p7 = pnand %p2178_p5, %p2175_p3 }
  0x48   : > { %2183 = shalt.err (!%p2180_p7)
}
  0x49   : > { %s2184_s11 = scalar_lea.vmem %s253_s16, 2048  ;;  %p2192_p1 = scmp.lt.s32.totalorder %s253_s16, %s253_s16 }
  0x4a   : > { %p2185_p9 = scmp.ne.s32.totalorder %s253_s16, %s2184_s11  ;;  %p2193_p2 = scmp.lt.s32.totalorder %s2184_s11, %s2184_s11 }
  0x4c   : > { %p2187_p12 = pnand %p2185_p9, %p2423_p13  ;;  %p2194_p4 = por %p2193_p2, %p2192_p1 }
  0x4e   : > { %p2188_p0 = pneg %p2187_p12 }
  0x50   : > { %p2195_p8 = pnand %p2194_p4, %p2188_p0 }
  0x52   : > { %2198 = shalt.err (!%p2195_p8)
}
  0x53   : > { %s2310_s14 = smov 64   ;;  %s2311_s22 = smov 4  }
  0x54   : > { %1857 = dma.hbm_to_vmem [thread:$0]  (!%p2407_p11), %s2805_s5, 2048, %s253_s16, [#allocation9], %s2310_s14, %s2310_s14, %s2311_s22  }
  0x55   : > { %s2493_s18 = sadd.s32 1, %s2303_s27   ;;  %s32_s20 = sadd.s32 1, %s2299_s26 }
  0x56   : > { %s29_s19 = ssub.s32 %s2303_s27, %s2493_s18  ;;  %p39_p8 = scmp.ne.s32.totalorder %s2299_s26, %s2295_s25 }
  0x57   : > { %p30_p4 = scmp.eq.s32.totalorder %s29_s19, 0  ;;  %p40_p13 = scmp.eq.s32.totalorder %s2303_s27, 0 }
  0x58   : > { %p1869_p6 = scmp.lt.s32.totalorder %s2303_s27, 2  ;;  %p2818_p3 = scmp.eq.s32.totalorder %s2377_s28, 1 }
  0x59   : > { %s2503_s21 = scalar_select %p30_p4, %s2299_s26, %s32_s20  }
  0x5a   : > { %p41_p10 = por %p40_p13, %p39_p8  ;;  %p2507_p5 = por %p2818_p3, %p39_p8 }
  0x5b   : > { %s269_s12 = sand.u32 1, %s2299_s26   ;;  %s1750_s29 = sshll.u32 %s2303_s27, 11 }
  0x5c   : > { %s1637_s16 = sshll.u32 %s269_s12, 7  ;;  %s2516_s14 = scalar_lea.hbm %s2800_s0, %s1750_s29 }
  0x5d   : > { %s273_s22 = scalar_lea.vmem [#allocation2], %s1637_s16  ;;  %p2518_p11 = pnand %p1869_p6, %p41_p10 }
  0x5e   : > { %s281_s8 = sshll.u32 %s273_s22, 4  ;;  %s2524_s19 = scalar_lea.sflag [#allocation3], %s269_s12  ;;  %s2522_s8 = int_to_ptr.vmem [resolvable:$true] %s281_s8 }
  0x5f   : > { %s2199_s20 = scalar_lea.hbm %s2516_s14, 2048  ;;  %p2201_p9 = pneg %p2518_p11 }
  0x60   : > { %p2200_p7 = scmp.ne.s32.totalorder %s2516_s14, %s2199_s20  ;;  %s2204_s10 = scalar_lea.hbm %s2800_s0, 4096 }
  0x61   : > { %p2205_p1 = scmp.lt.u32.totalorder %s2516_s14, %s2800_s0  ;;  %p2206_p2 = scmp.lt.u32.totalorder %s2204_s10, %s2199_s20 }
  0x62   : > { %p2202_p12 = pnand %p2201_p9, %p2200_p7  ;;  %p2208_p8 = scmp.lt.u32.totalorder %s2199_s20, %s2516_s14 }
  0x63   : > { %p2207_p4 = por %p2206_p2, %p2205_p1 }
  0x64   : > { %p2203_p0 = pneg %p2202_p12 }
  0x65   : > { %p2209_p13 = por %p2208_p8, %p2207_p4 }
  0x67   : > { %p2210_p6 = pnand %p2209_p13, %p2203_p0 }
  0x69   : > { %2213 = shalt.err (!%p2210_p6)
}
  0x6a   : > { %s2214_s12 = scalar_lea.vmem %s2522_s8, 2048  ;;  %s2312_s29 = smov [#allocation2]  }
  0x6b   : > { %p2215_p10 = scmp.ne.s32.totalorder %s2522_s8, %s2214_s12  ;;  %s2219_s16 = sshll.u32 %s2312_s29, 4  ;;  %s2220_s16 = int_to_ptr.vmem [resolvable:$false] %s2219_s16 }
  0x6c   : > { %s2221_s11 = scalar_lea.vmem %s2220_s16, 4096  ;;  %p2222_p12 = scmp.lt.s32.totalorder %s2522_s8, %s2220_s16 }
  0x6d   : > { %p2217_p3 = pnand %p2215_p10, %p2201_p9  ;;  %p2223_p1 = scmp.lt.s32.totalorder %s2221_s11, %s2214_s12 }
  0x6f   : > { %p2218_p7 = pneg %p2217_p3  ;;  %p2224_p2 = por %p2223_p1, %p2222_p12 }
  0x71   : > { %p2225_p4 = pnand %p2224_p2, %p2218_p7 }
  0x73   : > { %2228 = shalt.err (!%p2225_p4)
}
  0x74   : > { %1861 = dma.hbm_to_vmem [thread:$0]  (!%p2518_p11), %s2516_s14, 2048, %s2522_s8, %s2524_s19, %s2308_s13, %s2308_s13, %s2309_s15  }
  0x75   : > { %p2821_p9 = scmp.ne.s32.totalorder %s2815_s9, 0 }
  0x76   : > { %s2558_s20 = sand.u32 (!%p2821_p9), 1, %s2295_s25   ;;  %p2822_p0 = scmp.ne.s32.totalorder (!%p2821_p9), %s2812_s30, 0 }
  0x77   : > { %293 = sbr.rel (%p2821_p9) target bundleno = 961 (0x3c1), region = 48  ;;  %s1642_s10 = sshll.u32 (!%p2821_p9), %s2558_s20, 7 }
  0x78   : > { %s296_s22 = scalar_lea.sflag (!%p2821_p9), [#allocation3], %s2558_s20  ;;  %s2564_s17 = scalar_lea.vmem (!%p2821_p9), [#allocation2], %s1642_s10 }
  0x7e   : > { %2274 = dma.done.wait (%p2822_p0), %s296_s22, 2048  }
  0x7f   : > { %2276 = vsyncadd (%p2822_p0), %s296_s22, 4294965248  ;;  %p2823_p11 = scmp.eq.s32.totalorder %s2377_s28, 0 }
  0x81   : > { %2278 = dma.done.wait (%p2823_p11), [#allocation6], 8192   ;;  %p2824_p8 = pmov %p2823_p11 }
  0x83   : > { %2280 = vsyncadd (%p2824_p8), [#allocation6], 4294959104  ;;  %p2825_p13 = pmov %p2824_p8 }
  0x84   : > { %p2826_p6 = pmov %p2824_p8 }
  0x85   : > { %2282 = dma.done.wait (%p2825_p13), [#allocation9], 2048  }
  0x86   : > { %2284 = vsyncadd (%p2826_p6), [#allocation9], 4294965248  ;;  %v1915_v0 = vld [vmem:[#allocation5 + $0x4] ss:$8 sps:$4 sm:$0xff]   ;;  %v1917_v1 = vld [vmem:[#allocation5] ss:$8 sps:$4 sm:$0xff]  }
  0x87   : > { %645 = vmatprep.subr.bf16.mxu0 %v1915_v0  ;;  %v1918_v2 = vld [vmem:[#allocation5 + $0x14] ss:$8 sps:$4 sm:$0xff]   ;;  %v1920_v3 = vld [vmem:[#allocation5 + $0x10] ss:$8 sps:$4 sm:$0xff]   ;;  %v1921_v4 = vld [vmem:[#allocation5 + $0x24] ss:$8 sps:$4 sm:$0xff]  }
  0x88   : > { %646 = vmatpush1.bf16.msra.mxu0 %v1917_v1  ;;  %v1923_v5 = vld [vmem:[#allocation5 + $0x20] ss:$8 sps:$4 sm:$0xff]   ;;  %v1924_v6 = vld [vmem:[#allocation5 + $0x34] ss:$8 sps:$4 sm:$0xff]   ;;  %v1926_v7 = vld [vmem:[#allocation5 + $0x30] ss:$8 sps:$4 sm:$0xff]  }
  0x89   : > { %647 = vmatprep.subr.bf16.mxu0 %v1918_v2  ;;  %v1927_v8 = vld [vmem:[#allocation5 + $0x44] ss:$8 sps:$4 sm:$0xff]   ;;  %v1929_v9 = vld [vmem:[#allocation5 + $0x40] ss:$8 sps:$4 sm:$0xff]   ;;  %v1930_v10 = vld [vmem:[#allocation5 + $0x54] ss:$8 sps:$4 sm:$0xff]  }
  0x8a   : > { %v1932_v11 = vld [vmem:[#allocation5 + $0x50] ss:$8 sps:$4 sm:$0xff]   ;;  %v1933_v12 = vld [vmem:[#allocation5 + $0x64] ss:$8 sps:$4 sm:$0xff]   ;;  %v1935_v14 = vld [vmem:[#allocation5 + $0x60] ss:$8 sps:$4 sm:$0xff]  }
  0x8b   : > { %v1965_v13 = vld [vmem:[%s2564_s17 + $0x4] ss:$8 sps:$4 sm:$0xff]   ;;  %v1936_v15 = vld [vmem:[#allocation5 + $0x74] ss:$8 sps:$4 sm:$0xff]   ;;  %v1938_v16 = vld [vmem:[#allocation5 + $0x70] ss:$8 sps:$4 sm:$0xff]  }
  0x8c   : > { %648 = vmatpush1.bf16.msra.mxu0 %v1920_v3  ;;  %677 = vmatprep.mubr.bf16.mxu0 %v1965_v13  ;;  %v1939_v17 = vld [vmem:[#allocation5 + $0x84] ss:$8 sps:$4 sm:$0xff]   ;;  %v1941_v18 = vld [vmem:[#allocation5 + $0x80] ss:$8 sps:$4 sm:$0xff]   ;;  %v1942_v19 = vld [vmem:[#allocation5 + $0x94] ss:$8 sps:$4 sm:$0xff]  }
  0x8d   : > { %649 = vmatprep.subr.bf16.mxu0 %v1921_v4  ;;  %v1987_v20 = vld [vmem:[#allocation7 + $0x4] ss:$8 sps:$4 sm:$0xff]   ;;  %v1989_v21 = vld [vmem:[#allocation7] ss:$8 sps:$4 sm:$0xff]   ;;  %v1944_v22 = vld [vmem:[#allocation5 + $0x90] ss:$8 sps:$4 sm:$0xff]  }
  0x8e   : > { %1010 = vmatprep.subr.bf16.mxu1 %v1987_v20  ;;  %v1990_v23 = vld [vmem:[#allocation7 + $0x14] ss:$8 sps:$4 sm:$0xff]   ;;  %v1945_v24 = vld [vmem:[#allocation5 + $0xa4] ss:$8 sps:$4 sm:$0xff]   ;;  %v1992_v25 = vld [vmem:[#allocation7 + $0x10] ss:$8 sps:$4 sm:$0xff]  }
  0x8f   : > { %1011 = vmatpush1.bf16.msra.mxu1 %v1989_v21  ;;  %v1993_v26 = vld [vmem:[#allocation7 + $0x24] ss:$8 sps:$4 sm:$0xff]   ;;  %v1947_v27 = vld [vmem:[#allocation5 + $0xa0] ss:$8 sps:$4 sm:$0xff]   ;;  %v1948_v28 = vld [vmem:[#allocation5 + $0xb4] ss:$8 sps:$4 sm:$0xff]  }
  0x90   : > { %650 = vmatpush1.bf16.msra.mxu0 %v1923_v5  ;;  %1012 = vmatprep.subr.bf16.mxu1 %v1990_v23  ;;  %v1995_v29 = vld [vmem:[#allocation7 + $0x20] ss:$8 sps:$4 sm:$0xff]   ;;  %v1996_v30 = vld [vmem:[#allocation7 + $0x34] ss:$8 sps:$4 sm:$0xff]   ;;  %v1950_v31 = vld [vmem:[#allocation5 + $0xb0] ss:$8 sps:$4 sm:$0xff]  }
  0x91   : > { %651 = vmatprep.subr.bf16.mxu0 %v1924_v6  ;;  %v1951_v32 = vld [vmem:[#allocation5 + $0xc4] ss:$8 sps:$4 sm:$0xff]   ;;  %v1998_v33 = vld [vmem:[#allocation7 + $0x30] ss:$8 sps:$4 sm:$0xff]   ;;  %v1953_v35 = vld [vmem:[#allocation5 + $0xc0] ss:$8 sps:$4 sm:$0xff]  }
  0x92   : > { %v1999_v34 = vld [vmem:[#allocation7 + $0x44] ss:$8 sps:$4 sm:$0xff]   ;;  %v1954_v36 = vld [vmem:[#allocation5 + $0xd4] ss:$8 sps:$4 sm:$0xff]   ;;  %v2001_v37 = vld [vmem:[#allocation7 + $0x40] ss:$8 sps:$4 sm:$0xff]  }
  0x93   : > { %1013 = vmatpush1.bf16.msra.mxu1 %v1992_v25  ;;  %v2002_v38 = vld [vmem:[#allocation7 + $0x54] ss:$8 sps:$4 sm:$0xff]   ;;  %v1956_v39 = vld [vmem:[#allocation5 + $0xd0] ss:$8 sps:$4 sm:$0xff]   ;;  %v1957_v40 = vld [vmem:[#allocation5 + $0xe4] ss:$8 sps:$4 sm:$0xff]  }
  0x94   : > { %652 = vmatpush1.bf16.msra.mxu0 %v1926_v7  ;;  %1014 = vmatprep.subr.bf16.mxu1 %v1993_v26  ;;  %v2004_v41 = vld [vmem:[#allocation7 + $0x50] ss:$8 sps:$4 sm:$0xff]   ;;  %v2005_v42 = vld [vmem:[#allocation7 + $0x64] ss:$8 sps:$4 sm:$0xff]   ;;  %v1959_v43 = vld [vmem:[#allocation5 + $0xe0] ss:$8 sps:$4 sm:$0xff]  }
  0x95   : > { %653 = vmatprep.subr.bf16.mxu0 %v1927_v8  ;;  %v2007_v44 = vld [vmem:[#allocation7 + $0x60] ss:$8 sps:$4 sm:$0xff]   ;;  %v1960_v45 = vld [vmem:[#allocation5 + $0xf4] ss:$8 sps:$4 sm:$0xff]   ;;  %v1962_v47 = vld [vmem:[#allocation5 + $0xf0] ss:$8 sps:$4 sm:$0xff]  }
  0x96   : > { %v2008_v46 = vld [vmem:[#allocation7 + $0x74] ss:$8 sps:$4 sm:$0xff]   ;;  %v2010_v48 = vld [vmem:[#allocation7 + $0x70] ss:$8 sps:$4 sm:$0xff]   ;;  %v2011_v49 = vld [vmem:[#allocation7 + $0x84] ss:$8 sps:$4 sm:$0xff]  }
  0x97   : > { %1015 = vmatpush1.bf16.msra.mxu1 %v1995_v29  ;;  %v1963_v50 = vld [vmem:[%s2564_s17] ss:$8 sps:$4 sm:$0xff]   ;;  %v1966_v51 = vld [vmem:[%s2564_s17 + $0x14] ss:$8 sps:$4 sm:$0xff]   ;;  %v2016_v54 = vld [vmem:[#allocation7 + $0x90] ss:$8 sps:$4 sm:$0xff]  }
  0x98   : > { %654 = vmatpush1.bf16.msra.mxu0 %v1929_v9  ;;  %1016 = vmatprep.subr.bf16.mxu1 %v1996_v30  ;;  %v2013_v52 = vld [vmem:[#allocation7 + $0x80] ss:$8 sps:$4 sm:$0xff]   ;;  %v2014_v53 = vld [vmem:[#allocation7 + $0x94] ss:$8 sps:$4 sm:$0xff]   ;;  %v2017_v55 = vld [vmem:[#allocation7 + $0xa4] ss:$8 sps:$4 sm:$0xff]  }
  0x99   : > { %655 = vmatprep.subr.bf16.mxu0 %v1930_v10  ;;  %v1968_v56 = vld [vmem:[%s2564_s17 + $0x10] ss:$8 sps:$4 sm:$0xff]   ;;  %v1969_v57 = vld [vmem:[%s2564_s17 + $0x24] ss:$8 sps:$4 sm:$0xff]   ;;  %v2019_v58 = vld [vmem:[#allocation7 + $0xa0] ss:$8 sps:$4 sm:$0xff]  }
  0x9a   : > { %v2020_v59 = vld [vmem:[#allocation7 + $0xb4] ss:$8 sps:$4 sm:$0xff]   ;;  %v2022_v60 = vld [vmem:[#allocation7 + $0xb0] ss:$8 sps:$4 sm:$0xff]   ;;  %v2023_v61 = vld [vmem:[#allocation7 + $0xc4] ss:$8 sps:$4 sm:$0xff]  }
  0x9b   : > { %1017 = vmatpush1.bf16.msra.mxu1 %v1998_v33  ;;  %v1971_v62 = vld [vmem:[%s2564_s17 + $0x20] ss:$8 sps:$4 sm:$0xff]   ;;  %v1972_v63 = vld [vmem:[%s2564_s17 + $0x34] ss:$8 sps:$4 sm:$0xff]   ;;  %v1974_v2 = vld [vmem:[%s2564_s17 + $0x30] ss:$8 sps:$4 sm:$0xff]  }
  0x9c   : > { %656 = vmatpush1.bf16.msra.mxu0 %v1932_v11  ;;  %1018 = vmatprep.subr.bf16.mxu1 %v1999_v34  ;;  %v2025_v0 = vld [vmem:[#allocation7 + $0xc0] ss:$8 sps:$4 sm:$0xff]   ;;  %v2026_v1 = vld [vmem:[#allocation7 + $0xd4] ss:$8 sps:$4 sm:$0xff]   ;;  %v1975_v3 = vld [vmem:[%s2564_s17 + $0x44] ss:$8 sps:$4 sm:$0xff]  }
  0x9d   : > { %657 = vmatprep.subr.bf16.mxu0 %v1933_v12  ;;  %v1977_v4 = vld [vmem:[%s2564_s17 + $0x40] ss:$8 sps:$4 sm:$0xff]   ;;  %v1978_v5 = vld [vmem:[%s2564_s17 + $0x54] ss:$8 sps:$4 sm:$0xff]   ;;  %v1980_v6 = vld [vmem:[%s2564_s17 + $0x50] ss:$8 sps:$4 sm:$0xff]  }
  0x9e   : > { %v1981_v7 = vld [vmem:[%s2564_s17 + $0x64] ss:$8 sps:$4 sm:$0xff]   ;;  %v1983_v8 = vld [vmem:[%s2564_s17 + $0x60] ss:$8 sps:$4 sm:$0xff]   ;;  %v1984_v9 = vld [vmem:[%s2564_s17 + $0x74] ss:$8 sps:$4 sm:$0xff]  }
  0x9f   : > { %1019 = vmatpush1.bf16.msra.mxu1 %v2001_v37  ;;  %v1986_v10 = vld [vmem:[%s2564_s17 + $0x70] ss:$8 sps:$4 sm:$0xff]   ;;  %v2029_v12 = vld [vmem:[#allocation7 + $0xe4] ss:$8 sps:$4 sm:$0xff]   ;;  %v2031_v13 = vld [vmem:[#allocation7 + $0xe0] ss:$8 sps:$4 sm:$0xff]  }
  0xa0   : > { %658 = vmatpush1.bf16.msra.mxu0 %v1935_v14  ;;  %1020 = vmatprep.subr.bf16.mxu1 %v2002_v38  ;;  %v2028_v11 = vld [vmem:[#allocation7 + $0xd0] ss:$8 sps:$4 sm:$0xff]   ;;  %v2032_v14 = vld [vmem:[#allocation7 + $0xf4] ss:$8 sps:$4 sm:$0xff]   ;;  %v2605_v25 = vld [vmem:[#allocation8 + $0x20] sm:$0xff]   ;;  %s2723_s19 = scalar_lea.vmem [#allocation10], %s1642_s10 }
  0xa1   : > { %659 = vmatprep.subr.bf16.mxu0 %v1936_v15  ;;  %v2034_v15 = vld [vmem:[#allocation7 + $0xf0] ss:$8 sps:$4 sm:$0xff]   ;;  %v2608_v26 = vld [vmem:[#allocation8 + $0x68] sm:$0xff]   ;;  %v393_v30 = vld [vmem:[%s2802_s2] sm:$0x3]  ;;  %s1751_s12 = sshll.u32 %s2377_s28, 11 }
  0xa2   : > { %v2039_v20 = vld [vmem:[#allocation8 + $0x50] sm:$0xff]   ;;  %v2599_v23 = vld [vmem:[#allocation8 + $0x18] sm:$0xff]   ;;  %s1529_s29 = sshll.u32 %s2723_s19, 4  ;;  %s2752_s10 = scalar_lea.hbm %s2807_s7, %s1751_s12  ;;  %s2754_s29 = int_to_ptr.vmem [resolvable:$true] %s1529_s29 }
  0xa3   : > { %1021 = vmatpush1.bf16.msra.mxu1 %v2004_v41  ;;  %v2594_v21 = vld [vmem:[#allocation8 + $0x10] sm:$0xff]   ;;  %s1516_s22 = scalar_lea.sflag [#allocation4], %s2558_s20  ;;  %s2229_s17 = scalar_lea.vmem %s2754_s29, 2048 }
  0xa4   : > { %660 = vmatpush1.bf16.msra.mxu0 %v1938_v16  ;;  %1022 = vmatprep.subr.bf16.mxu1 %v2005_v42  ;;  %v2035_v16 = vld [vmem:[#allocation8 + $0x40] sm:$0xff]   ;;  %p2230_p10 = scmp.ne.s32.totalorder %s2754_s29, %s2229_s17  ;;  %s2313_s28 = smov [#allocation10]  }
  0xa5   : > { %661 = vmatprep.subr.bf16.mxu0 %v1939_v17  ;;  %v2036_v17 = vld [vmem:[#allocation8] sm:$0xff]   ;;  %s2233_s30 = sshll.u32 %s2313_s28, 4  ;;  %s2234_s30 = int_to_ptr.vmem [resolvable:$false] %s2233_s30 }
  0xa6   : > { %p2231_p3 = pnand %p2230_p10, %p2507_p5  ;;  %s2235_s9 = scalar_lea.vmem %s2234_s30, 4096 }
  0xa7   : > { %1023 = vmatpush1.bf16.msra.mxu1 %v2007_v44  ;;  %p2236_p12 = scmp.lt.s32.totalorder %s2754_s29, %s2234_s30  ;;  %p2237_p1 = scmp.lt.s32.totalorder %s2235_s9, %s2229_s17 }
  0xa8   : > { %662 = vmatpush1.bf16.msra.mxu0 %v1941_v18  ;;  %1024 = vmatprep.subr.bf16.mxu1 %v2008_v46  ;;  %v2037_v18 = vld [vmem:[#allocation8 + $0x48] sm:$0xff]   ;;  %p2232_p7 = pneg %p2231_p3 }
  0xa9   : > { %663 = vmatprep.subr.bf16.mxu0 %v1942_v19  ;;  %v2038_v19 = vld [vmem:[#allocation8 + $0x8] sm:$0xff]   ;;  %p2238_p2 = por %p2237_p1, %p2236_p12 }
  0xab   : > { %1025 = vmatpush1.bf16.msra.mxu1 %v2010_v48  ;;  %p2239_p4 = pnand %p2238_p2, %p2232_p7 }
  0xac   : > { %664 = vmatpush1.bf16.msra.mxu0 %v1944_v22  ;;  %1026 = vmatprep.subr.bf16.mxu1 %v2011_v49  ;;  %v2596_v22 = vld [vmem:[#allocation8 + $0x58] sm:$0xff]  }
  0xad   : > { %665 = vmatprep.subr.bf16.mxu0 %v1945_v24  ;;  %v2602_v24 = vld [vmem:[#allocation8 + $0x60] sm:$0xff]  }
  0xaf   : > { %1027 = vmatpush1.bf16.msra.mxu1 %v2013_v52 }
  0xb0   : > { %666 = vmatpush1.bf16.msra.mxu0 %v1947_v27  ;;  %1028 = vmatprep.subr.bf16.mxu1 %v2014_v53  ;;  %v395_v27 = vlaneseq }
  0xb1   : > { %667 = vmatprep.subr.bf16.mxu0 %v1948_v28 }
  0xb2   : > { %v2612_v28 = vshrl.u32 %v395_v27, 7 }
  0xb3   : > { %1029 = vmatpush1.bf16.msra.mxu1 %v2016_v54 }
  0xb4   : > { %668 = vmatpush1.bf16.msra.mxu0 %v1950_v31  ;;  %1030 = vmatprep.subr.bf16.mxu1 %v2017_v55  ;;  %v397_v29 = vsub.s32 0, %v2612_v28  ;;  %v401_v31 = vsub.s32 1, %v2612_v28 }
  0xb5   : > { %669 = vmatprep.subr.bf16.mxu0 %v1951_v32 }
  0xb6   : > { %v2621_v32 = vrot.slane %v393_v30, %v397_v29  ;;  %v2625_v33 = vrot.slane %v393_v30, %v401_v31 }
  0xb7   : > { %1031 = vmatpush1.bf16.msra.mxu1 %v2019_v58 }
  0xb8   : > { %670 = vmatpush1.bf16.msra.mxu0 %v1953_v35  ;;  %1032 = vmatprep.subr.bf16.mxu1 %v2020_v59 }
  0xb9   : > { %671 = vmatprep.subr.bf16.mxu0 %v1954_v36 }
  0xbb   : > { %1033 = vmatpush1.bf16.msra.mxu1 %v2022_v60 }
  0xbc   : > { %672 = vmatpush1.bf16.msra.mxu0 %v1956_v39  ;;  %1034 = vmatprep.subr.bf16.mxu1 %v2023_v61 }
  0xbd   : > { %673 = vmatprep.subr.bf16.mxu0 %v1957_v40 }
  0xbf   : > { %1035 = vmatpush1.bf16.msra.mxu1 %v2025_v0 }
  0xc0   : > { %674 = vmatpush1.bf16.msra.mxu0 %v1959_v43  ;;  %1036 = vmatprep.subr.bf16.mxu1 %v2026_v1 }
  0xc1   : > { %675 = vmatprep.subr.bf16.mxu0 %v1960_v45 }
  0xc3   : > { %1037 = vmatpush1.bf16.msra.mxu1 %v2028_v11 }
  0xc4   : > { %676 = vmatpush1.bf16.msra.mxu0 %v1962_v47  ;;  %1038 = vmatprep.subr.bf16.mxu1 %v2029_v12 }
  0xc5   : > { %1752 = vmatprep.subr.bf16.mxu0 %v2035_v16 }
  0xc7   : > { %678 = vmatmul.mubr.bf16.vlgmr.msra.gmra.mrb[0].mxu0 %v1963_v50  ;;  %1039 = vmatpush1.bf16.msra.mxu1 %v2031_v13 }
  0xc8   : > { %687 = vmatprep.mubr.bf16.mxu0 %v1966_v51  ;;  %1040 = vmatprep.subr.bf16.mxu1 %v2032_v14 }
  0xc9   : > { %1753 = vmatpush3.bf16.msra.mxu0 %v2036_v17 }
  0xca   : > { %1754 = vmatprep.subr.bf16.mxu0 %v2037_v18 }
  0xcb   : > { %1041 = vmatpush1.bf16.msra.mxu1 %v2034_v15 }
  0xcc   : > { %1816 = vmatprep.subr.bf16.mxu1 %v2035_v16 }
  0xcd   : > { %1755 = vmatpush3.bf16.msra.mxu0 %v2038_v19 }
  0xce   : > { %1756 = vmatprep.subr.bf16.mxu0 %v2039_v20 }
  0xcf   : > { %688 = vmatmul.mubr.bf16.gmra.mrb[4].mxu0 %v1968_v56 }
  0xd0   : > { %697 = vmatprep.mubr.bf16.mxu0 %v1969_v57 }
  0xd1   : > { %1757 = vmatpush3.bf16.msra.mxu0 %v2594_v21 }
  0xd2   : > { %1758 = vmatprep.subr.bf16.mxu0 %v2596_v22 }
  0xd5   : > { %1759 = vmatpush3.bf16.msra.mxu0 %v2599_v23 }
  0xd6   : > { %1760 = vmatprep.subr.bf16.mxu0 %v2602_v24 }
  0xd7   : > { %698 = vmatmul.mubr.bf16.gmra.mrb[8].mxu0 %v1971_v62 }
  0xd8   : > { %707 = vmatprep.mubr.bf16.mxu0 %v1972_v63 }
  0xd9   : > { %1761 = vmatpush3.bf16.msra.mxu0 %v2605_v25 }
  0xda   : > { %1762 = vmatprep.subr.bf16.mxu0 %v2608_v26 }
  0xdf   : > { %708 = vmatmul.mubr.bf16.gmra.mrb[12].mxu0 %v1974_v2 }
  0xe0   : > { %717 = vmatprep.mubr.bf16.mxu0 %v1975_v3 }
  0xe7   : > { %718 = vmatmul.mubr.bf16.gmra.mrb[16].mxu0 %v1977_v4 }
  0xe8   : > { %727 = vmatprep.mubr.bf16.mxu0 %v1978_v5 }
  0xef   : > { %728 = vmatmul.mubr.bf16.gmra.mrb[20].mxu0 %v1980_v6 }
  0xf0   : > { %737 = vmatprep.mubr.bf16.mxu0 %v1981_v7 }
  0xf7   : > { %738 = vmatmul.mubr.bf16.gmra.mrb[24].mxu0 %v1983_v8 }
  0xf8   : > { %747 = vmatprep.mubr.bf16.mxu0 %v1984_v9 }
  0xff   : > { %748 = vmatmul.mubr.bf16.gmra.mrb[28].mxu0 %v1986_v10 }
 0x19a   : > { %v679_v34 = vpop.f32.mrb[0].mxu0 }
 0x19b   : > { %v680_v35 = vadd.f32 %v679_v34, %v2621_v32  ;;  %v681_v36 = vpop.f32.mrb[1].mxu0 }
 0x19c   : > { %v682_v37 = vadd.f32 %v681_v36, %v2625_v33  ;;  %v683_v38 = vpop.f32.mrb[2].mxu0 }
 0x19d   : > { %v684_v39 = vadd.f32 %v683_v38, %v2621_v32  ;;  %v685_v40 = vpop.f32.mrb[3].mxu0  ;;  %v758_v42 = vmax.f32 %v680_v35, 0.0 }
 0x19e   : > { %v686_v41 = vadd.f32 %v685_v40, %v2625_v33  ;;  %v759_v44 = vmax.f32 %v682_v37, 0.0 }
 0x19f   : > { %v760_v43 = vmax.f32 %v684_v39, 0.0 }
 0x1a0   : > { %v761_v45 = vmax.f32 %v686_v41, 0.0 }
 0x1a1   : > { %v790_v46 = vpack.c.bf16 %v760_v43, %v758_v42 }
 0x1a2   : > { %v689_v47 = vpop.f32.mrb[4].mxu0  ;;  %v791_v48 = vpack.c.bf16 %v761_v45, %v759_v44 }
 0x1a3   : > { %v690_v49 = vadd.f32 %v689_v47, %v2621_v32  ;;  %v691_v50 = vpop.f32.mrb[5].mxu0 }
 0x1a4   : > { %v692_v51 = vadd.f32 %v691_v50, %v2625_v33  ;;  %v693_v52 = vpop.f32.mrb[6].mxu0  ;;  %1042 = vmatprep.mubr.bf16.mxu1 %v791_v48 }
 0x1a5   : > { %v694_v53 = vadd.f32 %v693_v52, %v2621_v32  ;;  %v695_v54 = vpop.f32.mrb[7].mxu0  ;;  %1043 = vmatmul.mubr.bf16.vlgmr.msra.gmra.mrb[0].mxu1 %v790_v46  ;;  %v762_v56 = vmax.f32 %v690_v49, 0.0 }
 0x1a6   : > { %v696_v55 = vadd.f32 %v695_v54, %v2625_v33  ;;  %1824 = vmatpush3.bf16.msra.mxu1 %v2036_v17  ;;  %v763_v58 = vmax.f32 %v692_v51, 0.0 }
 0x1a7   : > { %v764_v57 = vmax.f32 %v694_v53, 0.0  ;;  %1817 = vmatprep.subr.bf16.mxu1 %v2037_v18 }
 0x1a8   : > { %v765_v59 = vmax.f32 %v696_v55, 0.0 }
 0x1a9   : > { %v792_v60 = vpack.c.bf16 %v764_v57, %v762_v56 }
 0x1aa   : > { %v793_v61 = vpack.c.bf16 %v765_v59, %v763_v58  ;;  %v699_v62 = vpop.f32.mrb[8].mxu0  ;;  %1825 = vmatpush3.bf16.msra.mxu1 %v2038_v19 }
 0x1ab   : > { %v700_v63 = vadd.f32 %v699_v62, %v2621_v32  ;;  %v701_v0 = vpop.f32.mrb[9].mxu0  ;;  %1818 = vmatprep.subr.bf16.mxu1 %v2039_v20 }
 0x1ac   : > { %v702_v1 = vadd.f32 %v701_v0, %v2625_v33  ;;  %v703_v2 = vpop.f32.mrb[10].mxu0  ;;  %1052 = vmatprep.mubr.bf16.mxu1 %v793_v61 }
 0x1ad   : > { %v704_v3 = vadd.f32 %v703_v2, %v2621_v32  ;;  %v705_v4 = vpop.f32.mrb[11].mxu0  ;;  %1053 = vmatmul.mubr.bf16.gmra.mrb[4].mxu1 %v792_v60  ;;  %v766_v6 = vmax.f32 %v700_v63, 0.0 }
 0x1ae   : > { %v706_v5 = vadd.f32 %v705_v4, %v2625_v33  ;;  %1826 = vmatpush3.bf16.msra.mxu1 %v2594_v21  ;;  %v767_v8 = vmax.f32 %v702_v1, 0.0 }
 0x1af   : > { %v768_v7 = vmax.f32 %v704_v3, 0.0  ;;  %1819 = vmatprep.subr.bf16.mxu1 %v2596_v22 }
 0x1b0   : > { %v769_v9 = vmax.f32 %v706_v5, 0.0 }
 0x1b1   : > { %v794_v10 = vpack.c.bf16 %v768_v7, %v766_v6 }
 0x1b2   : > { %v795_v11 = vpack.c.bf16 %v769_v9, %v767_v8  ;;  %v709_v12 = vpop.f32.mrb[12].mxu0  ;;  %1827 = vmatpush3.bf16.msra.mxu1 %v2599_v23 }
 0x1b3   : > { %v710_v13 = vadd.f32 %v709_v12, %v2621_v32  ;;  %v711_v14 = vpop.f32.mrb[13].mxu0  ;;  %1820 = vmatprep.subr.bf16.mxu1 %v2602_v24 }
 0x1b4   : > { %v712_v15 = vadd.f32 %v711_v14, %v2625_v33  ;;  %v713_v16 = vpop.f32.mrb[14].mxu0  ;;  %1062 = vmatprep.mubr.bf16.mxu1 %v795_v11 }
 0x1b5   : > { %v714_v17 = vadd.f32 %v713_v16, %v2621_v32  ;;  %v715_v18 = vpop.f32.mrb[15].mxu0  ;;  %1063 = vmatmul.mubr.bf16.gmra.mrb[8].mxu1 %v794_v10  ;;  %v770_v20 = vmax.f32 %v710_v13, 0.0 }
 0x1b6   : > { %v716_v19 = vadd.f32 %v715_v18, %v2625_v33  ;;  %1828 = vmatpush3.bf16.msra.mxu1 %v2605_v25  ;;  %v771_v22 = vmax.f32 %v712_v15, 0.0 }
 0x1b7   : > { %v772_v21 = vmax.f32 %v714_v17, 0.0  ;;  %1821 = vmatprep.subr.bf16.mxu1 %v2608_v26 }
 0x1b8   : > { %v773_v23 = vmax.f32 %v716_v19, 0.0 }
 0x1b9   : > { %v796_v27 = vpack.c.bf16 %v772_v21, %v770_v20 }
 0x1ba   : > { %v797_v24 = vpack.c.bf16 %v773_v23, %v771_v22  ;;  %v719_v30 = vpop.f32.mrb[16].mxu0  ;;  %v2046_v23 = vld [vmem:[#allocation8 + $0x28] sm:$0xff]  }
 0x1bb   : > { %v720_v34 = vadd.f32 %v719_v30, %v2621_v32  ;;  %v721_v35 = vpop.f32.mrb[17].mxu0  ;;  %1763 = vmatpush3.bf16.msra.mxu0 %v2046_v23  ;;  %1829 = vmatpush3.bf16.msra.mxu1 %v2046_v23  ;;  %v2050_v30 = vld [vmem:[#allocation8 + $0x38] sm:$0xff]  }
 0x1bc   : > { %v722_v36 = vadd.f32 %v721_v35, %v2625_v33  ;;  %v723_v37 = vpop.f32.mrb[18].mxu0  ;;  %1072 = vmatprep.mubr.bf16.mxu1 %v797_v24  ;;  %v2048_v24 = vld [vmem:[#allocation8 + $0x30] sm:$0xff]  }
 0x1bd   : > { %v724_v38 = vadd.f32 %v723_v37, %v2621_v32  ;;  %v725_v39 = vpop.f32.mrb[19].mxu0  ;;  %1073 = vmatmul.mubr.bf16.gmra.mrb[12].mxu1 %v796_v27  ;;  %v774_v40 = vmax.f32 %v720_v34, 0.0  ;;  %v2047_v27 = vld [vmem:[#allocation8 + $0x70] sm:$0xff]  }
 0x1be   : > { %v726_v25 = vadd.f32 %v725_v39, %v2625_v33  ;;  %v775_v41 = vmax.f32 %v722_v36, 0.0  ;;  %1764 = vmatprep.subr.bf16.mxu0 %v2047_v27  ;;  %1822 = vmatprep.subr.bf16.mxu1 %v2047_v27 }
 0x1bf   : > { %v776_v26 = vmax.f32 %v724_v38, 0.0  ;;  %1765 = vmatpush3.bf16.msra.mxu0 %v2048_v24  ;;  %1830 = vmatpush3.bf16.msra.mxu1 %v2048_v24 }
 0x1c0   : > { %v777_v42 = vmax.f32 %v726_v25, 0.0 }
 0x1c1   : > { %v798_v43 = vpack.c.bf16 %v776_v26, %v774_v40 }
 0x1c2   : > { %v799_v44 = vpack.c.bf16 %v777_v42, %v775_v41  ;;  %v729_v45 = vpop.f32.mrb[20].mxu0 }
 0x1c3   : > { %v730_v46 = vadd.f32 %v729_v45, %v2621_v32  ;;  %v731_v47 = vpop.f32.mrb[21].mxu0 }
 0x1c4   : > { %v732_v48 = vadd.f32 %v731_v47, %v2625_v33  ;;  %v733_v49 = vpop.f32.mrb[22].mxu0  ;;  %1082 = vmatprep.mubr.bf16.mxu1 %v799_v44 }
 0x1c5   : > { %v734_v50 = vadd.f32 %v733_v49, %v2621_v32  ;;  %v735_v51 = vpop.f32.mrb[23].mxu0  ;;  %1083 = vmatmul.mubr.bf16.gmra.mrb[16].mxu1 %v798_v43  ;;  %v778_v53 = vmax.f32 %v730_v46, 0.0 }
 0x1c6   : > { %v736_v52 = vadd.f32 %v735_v51, %v2625_v33  ;;  %v779_v55 = vmax.f32 %v732_v48, 0.0 }
 0x1c7   : > { %v780_v54 = vmax.f32 %v734_v50, 0.0 }
 0x1c8   : > { %v781_v56 = vmax.f32 %v736_v52, 0.0 }
 0x1c9   : > { %v800_v57 = vpack.c.bf16 %v780_v54, %v778_v53 }
 0x1ca   : > { %v801_v58 = vpack.c.bf16 %v781_v56, %v779_v55  ;;  %v739_v59 = vpop.f32.mrb[24].mxu0 }
 0x1cb   : > { %v740_v60 = vadd.f32 %v739_v59, %v2621_v32  ;;  %v741_v61 = vpop.f32.mrb[25].mxu0 }
 0x1cc   : > { %v742_v62 = vadd.f32 %v741_v61, %v2625_v33  ;;  %v743_v63 = vpop.f32.mrb[26].mxu0  ;;  %1092 = vmatprep.mubr.bf16.mxu1 %v801_v58 }
 0x1cd   : > { %v744_v0 = vadd.f32 %v743_v63, %v2621_v32  ;;  %v745_v1 = vpop.f32.mrb[27].mxu0  ;;  %1093 = vmatmul.mubr.bf16.gmra.mrb[20].mxu1 %v800_v57  ;;  %v782_v3 = vmax.f32 %v740_v60, 0.0 }
 0x1ce   : > { %v746_v2 = vadd.f32 %v745_v1, %v2625_v33  ;;  %v783_v5 = vmax.f32 %v742_v62, 0.0 }
 0x1cf   : > { %v784_v4 = vmax.f32 %v744_v0, 0.0 }
 0x1d0   : > { %v785_v6 = vmax.f32 %v746_v2, 0.0 }
 0x1d1   : > { %v802_v7 = vpack.c.bf16 %v784_v4, %v782_v3 }
 0x1d2   : > { %v803_v8 = vpack.c.bf16 %v785_v6, %v783_v5  ;;  %v749_v9 = vpop.f32.mrb[28].mxu0 }
 0x1d3   : > { %v750_v10 = vadd.f32 %v749_v9, %v2621_v32  ;;  %v751_v11 = vpop.f32.mrb[29].mxu0 }
 0x1d4   : > { %v752_v12 = vadd.f32 %v751_v11, %v2625_v33  ;;  %v753_v13 = vpop.f32.mrb[30].mxu0  ;;  %1102 = vmatprep.mubr.bf16.mxu1 %v803_v8 }
 0x1d5   : > { %v754_v14 = vadd.f32 %v753_v13, %v2621_v32  ;;  %v755_v15 = vpop.f32.mrb[31].mxu0  ;;  %1103 = vmatmul.mubr.bf16.gmra.mrb[24].mxu1 %v802_v7  ;;  %v786_v17 = vmax.f32 %v750_v10, 0.0  ;;  %v2049_v32 = vld [vmem:[#allocation8 + $0x78] sm:$0xff]  }
 0x1d6   : > { %v756_v16 = vadd.f32 %v755_v15, %v2625_v33  ;;  %v787_v19 = vmax.f32 %v752_v12, 0.0  ;;  %1766 = vmatprep.subr.bf16.mxu0 %v2049_v32  ;;  %1823 = vmatprep.subr.bf16.mxu1 %v2049_v32  ;;  %v838_v33 = vld [vmem:[%s2804_s4] sm:$0x3] }
 0x1d7   : > { %v788_v18 = vmax.f32 %v754_v14, 0.0  ;;  %1767 = vmatpush3.bf16.msra.mxu0 %v2050_v30  ;;  %1831 = vmatpush3.bf16.msra.mxu1 %v2050_v30  ;;  %v2670_v34 = vrot.slane %v838_v33, %v397_v29  ;;  %v2674_v35 = vrot.slane %v838_v33, %v401_v31 }
 0x1d8   : > { %v789_v20 = vmax.f32 %v756_v16, 0.0 }
 0x1d9   : > { %v804_v21 = vpack.c.bf16 %v788_v18, %v786_v17 }
 0x1da   : > { %v805_v22 = vpack.c.bf16 %v789_v20, %v787_v19 }
 0x1dc   : > { %1112 = vmatprep.mubr.bf16.mxu1 %v805_v22 }
 0x1dd   : > { %1113 = vmatmul.mubr.bf16.gmra.mrb[28].mxu1 %v804_v21 }
 0x278   : > { %v1044_v36 = vpop.f32.mrb[0].mxu1 }
 0x279   : > { %v1045_v37 = vadd.f32 %v1044_v36, %v2670_v34  ;;  %v1046_v38 = vpop.f32.mrb[1].mxu1 }
 0x27a   : > { %v1047_v39 = vadd.f32 %v1046_v38, %v2674_v35  ;;  %v1048_v25 = vpop.f32.mrb[2].mxu1 }
 0x27b   : > { %v1049_v40 = vadd.f32 %v1048_v25, %v2670_v34  ;;  %v1050_v26 = vpop.f32.mrb[3].mxu1  ;;  %v1123_v42 = vmax.f32 %v1045_v37, 0.0 }
 0x27c   : > { %v1051_v41 = vadd.f32 %v1050_v26, %v2674_v35  ;;  %v1124_v29 = vmax.f32 %v1047_v39, 0.0 }
 0x27d   : > { %v1125_v43 = vmax.f32 %v1049_v40, 0.0 }
 0x27e   : > { %v1126_v44 = vmax.f32 %v1051_v41, 0.0 }
 0x27f   : > { %v1155_v45 = vpack.c.bf16 %v1125_v43, %v1123_v42 }
 0x280   : > { %v1156_v28 = vpack.c.bf16 %v1126_v44, %v1124_v29  ;;  %v1054_v31 = vpop.f32.mrb[4].mxu1 }
 0x281   : > { %v1055_v46 = vadd.f32 %v1054_v31, %v2670_v34  ;;  %v1056_v47 = vpop.f32.mrb[5].mxu1 }
 0x282   : > { %v1057_v48 = vadd.f32 %v1056_v47, %v2674_v35  ;;  %v1058_v49 = vpop.f32.mrb[6].mxu1  ;;  %1338 = vmatprep.mubr.bf16.mxu0 %v1156_v28 }
 0x283   : > { %v1059_v50 = vadd.f32 %v1058_v49, %v2670_v34  ;;  %v1060_v51 = vpop.f32.mrb[7].mxu1  ;;  %1339 = vmatmul.mubr.bf16.vlgmr.msra.gmra.mrb[32].mxu0 %v1155_v45  ;;  %v1127_v53 = vmax.f32 %v1055_v46, 0.0 }
 0x284   : > { %v1061_v52 = vadd.f32 %v1060_v51, %v2674_v35  ;;  %v1128_v55 = vmax.f32 %v1057_v48, 0.0 }
 0x285   : > { %v1129_v54 = vmax.f32 %v1059_v50, 0.0 }
 0x286   : > { %v1130_v56 = vmax.f32 %v1061_v52, 0.0 }
 0x287   : > { %v1157_v57 = vpack.c.bf16 %v1129_v54, %v1127_v53 }
 0x288   : > { %v1158_v58 = vpack.c.bf16 %v1130_v56, %v1128_v55  ;;  %v1064_v59 = vpop.f32.mrb[8].mxu1 }
 0x289   : > { %v1065_v60 = vadd.f32 %v1064_v59, %v2670_v34  ;;  %v1066_v61 = vpop.f32.mrb[9].mxu1 }
 0x28a   : > { %v1067_v62 = vadd.f32 %v1066_v61, %v2674_v35  ;;  %v1068_v63 = vpop.f32.mrb[10].mxu1  ;;  %1346 = vmatprep.mubr.bf16.mxu0 %v1158_v58 }
 0x28b   : > { %v1069_v0 = vadd.f32 %v1068_v63, %v2670_v34  ;;  %v1070_v1 = vpop.f32.mrb[11].mxu1  ;;  %1347 = vmatmul.mubr.bf16.gmra.mrb[36].mxu0 %v1157_v57  ;;  %v1131_v3 = vmax.f32 %v1065_v60, 0.0 }
 0x28c   : > { %v1071_v2 = vadd.f32 %v1070_v1, %v2674_v35  ;;  %v1132_v5 = vmax.f32 %v1067_v62, 0.0 }
 0x28d   : > { %v1133_v4 = vmax.f32 %v1069_v0, 0.0 }
 0x28e   : > { %v1134_v6 = vmax.f32 %v1071_v2, 0.0 }
 0x28f   : > { %v1159_v7 = vpack.c.bf16 %v1133_v4, %v1131_v3 }
 0x290   : > { %v1160_v8 = vpack.c.bf16 %v1134_v6, %v1132_v5  ;;  %v1074_v9 = vpop.f32.mrb[12].mxu1 }
 0x291   : > { %v1075_v10 = vadd.f32 %v1074_v9, %v2670_v34  ;;  %v1076_v11 = vpop.f32.mrb[13].mxu1 }
 0x292   : > { %v1077_v12 = vadd.f32 %v1076_v11, %v2674_v35  ;;  %v1078_v13 = vpop.f32.mrb[14].mxu1  ;;  %1354 = vmatprep.mubr.bf16.mxu0 %v1160_v8 }
 0x293   : > { %v1079_v14 = vadd.f32 %v1078_v13, %v2670_v34  ;;  %v1080_v15 = vpop.f32.mrb[15].mxu1  ;;  %1355 = vmatmul.mubr.bf16.gmra.mrb[40].mxu0 %v1159_v7  ;;  %v1135_v17 = vmax.f32 %v1075_v10, 0.0 }
 0x294   : > { %v1081_v16 = vadd.f32 %v1080_v15, %v2674_v35  ;;  %v1136_v19 = vmax.f32 %v1077_v12, 0.0 }
 0x295   : > { %v1137_v18 = vmax.f32 %v1079_v14, 0.0 }
 0x296   : > { %v1138_v20 = vmax.f32 %v1081_v16, 0.0 }
 0x297   : > { %v1161_v21 = vpack.c.bf16 %v1137_v18, %v1135_v17  ;;  %v2711_v18 = vld [vmem:[%s2806_s6] ss:$0 sm:$0xff] }
 0x298   : > { %v1162_v22 = vpack.c.bf16 %v1138_v20, %v1136_v19  ;;  %v1084_v23 = vpop.f32.mrb[16].mxu1 }
 0x299   : > { %v1085_v27 = vadd.f32 %v1084_v23, %v2670_v34  ;;  %v1086_v24 = vpop.f32.mrb[17].mxu1 }
 0x29a   : > { %v1087_v32 = vadd.f32 %v1086_v24, %v2674_v35  ;;  %v1088_v30 = vpop.f32.mrb[18].mxu1  ;;  %1362 = vmatprep.mubr.bf16.mxu0 %v1162_v22 }
 0x29b   : > { %v1089_v33 = vadd.f32 %v1088_v30, %v2670_v34  ;;  %v1090_v36 = vpop.f32.mrb[19].mxu1  ;;  %1363 = vmatmul.mubr.bf16.gmra.mrb[44].mxu0 %v1161_v21  ;;  %v1139_v38 = vmax.f32 %v1085_v27, 0.0 }
 0x29c   : > { %v1091_v37 = vadd.f32 %v1090_v36, %v2674_v35  ;;  %v1140_v25 = vmax.f32 %v1087_v32, 0.0 }
 0x29d   : > { %v1141_v39 = vmax.f32 %v1089_v33, 0.0 }
 0x29e   : > { %v1142_v40 = vmax.f32 %v1091_v37, 0.0 }
 0x29f   : > { %v1163_v26 = vpack.c.bf16 %v1141_v39, %v1139_v38 }
 0x2a0   : > { %v1164_v41 = vpack.c.bf16 %v1142_v40, %v1140_v25  ;;  %v1094_v42 = vpop.f32.mrb[20].mxu1 }
 0x2a1   : > { %v1095_v43 = vadd.f32 %v1094_v42, %v2670_v34  ;;  %v1096_v29 = vpop.f32.mrb[21].mxu1 }
 0x2a2   : > { %v1097_v44 = vadd.f32 %v1096_v29, %v2674_v35  ;;  %v1098_v45 = vpop.f32.mrb[22].mxu1  ;;  %1370 = vmatprep.mubr.bf16.mxu1 %v1164_v41 }
 0x2a3   : > { %v1099_v28 = vadd.f32 %v1098_v45, %v2670_v34  ;;  %v1100_v31 = vpop.f32.mrb[23].mxu1  ;;  %1371 = vmatmul.mubr.bf16.vlgmr.msra.gmra.mrb[32].mxu1 %v1163_v26  ;;  %v1143_v47 = vmax.f32 %v1095_v43, 0.0 }
 0x2a4   : > { %v1101_v46 = vadd.f32 %v1100_v31, %v2674_v35  ;;  %v1144_v49 = vmax.f32 %v1097_v44, 0.0 }
 0x2a5   : > { %v1145_v48 = vmax.f32 %v1099_v28, 0.0 }
 0x2a6   : > { %v1146_v50 = vmax.f32 %v1101_v46, 0.0 }
 0x2a7   : > { %v1165_v51 = vpack.c.bf16 %v1145_v48, %v1143_v47 }
 0x2a8   : > { %v1166_v52 = vpack.c.bf16 %v1146_v50, %v1144_v49  ;;  %v1104_v53 = vpop.f32.mrb[24].mxu1 }
 0x2a9   : > { %v1105_v54 = vadd.f32 %v1104_v53, %v2670_v34  ;;  %v1106_v55 = vpop.f32.mrb[25].mxu1 }
 0x2aa   : > { %v1107_v56 = vadd.f32 %v1106_v55, %v2674_v35  ;;  %v1108_v57 = vpop.f32.mrb[26].mxu1  ;;  %1378 = vmatprep.mubr.bf16.mxu1 %v1166_v52 }
 0x2ab   : > { %v1109_v58 = vadd.f32 %v1108_v57, %v2670_v34  ;;  %v1110_v59 = vpop.f32.mrb[27].mxu1  ;;  %1379 = vmatmul.mubr.bf16.gmra.mrb[36].mxu1 %v1165_v51  ;;  %v1147_v61 = vmax.f32 %v1105_v54, 0.0 }
 0x2ac   : > { %v1111_v60 = vadd.f32 %v1110_v59, %v2674_v35  ;;  %v1148_v63 = vmax.f32 %v1107_v56, 0.0 }
 0x2ad   : > { %v1149_v62 = vmax.f32 %v1109_v58, 0.0 }
 0x2ae   : > { %v1150_v0 = vmax.f32 %v1111_v60, 0.0 }
 0x2af   : > { %v1167_v1 = vpack.c.bf16 %v1149_v62, %v1147_v61 }
 0x2b0   : > { %v1168_v2 = vpack.c.bf16 %v1150_v0, %v1148_v63  ;;  %v1114_v3 = vpop.f32.mrb[28].mxu1 }
 0x2b1   : > { %v1115_v4 = vadd.f32 %v1114_v3, %v2670_v34  ;;  %v1116_v5 = vpop.f32.mrb[29].mxu1 }
 0x2b2   : > { %v1117_v6 = vadd.f32 %v1116_v5, %v2674_v35  ;;  %v1118_v7 = vpop.f32.mrb[30].mxu1  ;;  %1386 = vmatprep.mubr.bf16.mxu1 %v1168_v2 }
 0x2b3   : > { %v1119_v8 = vadd.f32 %v1118_v7, %v2670_v34  ;;  %v1120_v9 = vpop.f32.mrb[31].mxu1  ;;  %1387 = vmatmul.mubr.bf16.gmra.mrb[40].mxu1 %v1167_v1  ;;  %v1151_v11 = vmax.f32 %v1115_v4, 0.0 }
 0x2b4   : > { %v1121_v10 = vadd.f32 %v1120_v9, %v2674_v35  ;;  %v1152_v13 = vmax.f32 %v1117_v6, 0.0 }
 0x2b5   : > { %v1153_v12 = vmax.f32 %v1119_v8, 0.0 }
 0x2b6   : > { %v1154_v14 = vmax.f32 %v1121_v10, 0.0 }
 0x2b7   : > { %v1169_v15 = vpack.c.bf16 %v1153_v12, %v1151_v11 }
 0x2b8   : > { %v1170_v16 = vpack.c.bf16 %v1154_v14, %v1152_v13 }
 0x2ba   : > { %1394 = vmatprep.mubr.bf16.mxu1 %v1170_v16 }
 0x2bb   : > { %1395 = vmatmul.mubr.bf16.gmra.mrb[44].mxu1 %v1169_v15 }
 0x356   : > { %v1768_v17 = vpop.f32.mrb[32].mxu0 }
 0x357   : > { %v1769_v19 = vpop.f32.mrb[33].mxu0 }
 0x358   : > { %v1770_v34 = vadd.f32 %v1769_v19, %v1768_v17  ;;  %v1771_v20 = vpop.f32.mrb[34].mxu0 }
 0x359   : > { %v1772_v21 = vpop.f32.mrb[35].mxu0 }
 0x35a   : > { %v1341_v35 = vadd.f32 %v1770_v34, %v2711_v18  ;;  %v1773_v22 = vadd.f32 %v1772_v21, %v1771_v20 }
 0x35c   : > { %v1403_v23 = vsub.f32 0.0, %v1341_v35  ;;  %v1344_v27 = vadd.f32 %v1773_v22, %v2711_v18 }
 0x35e   : > { %v1419_v24 = vmul.f32 1.442695, %v1403_v23  ;;  %v1404_v32 = vsub.f32 0.0, %v1344_v27  ;;  %v1774_v30 = vpop.f32.mrb[36].mxu0 }
 0x35f   : > { %v1775_v33 = vpop.f32.mrb[37].mxu0 }
 0x360   : > { %2051 = vpow2.f32 %v1419_v24  ;;  %v1421_v36 = vmul.f32 1.442695, %v1404_v32  ;;  %v1776_v37 = vadd.f32 %v1775_v33, %v1774_v30  ;;  %v1777_v38 = vpop.f32.mrb[38].mxu0 }
 0x361   : > { %v1778_v39 = vpop.f32.mrb[39].mxu0 }
 0x362   : > { %2053 = vpow2.f32 %v1421_v36  ;;  %v1349_v25 = vadd.f32 %v1776_v37, %v2711_v18  ;;  %v1779_v40 = vadd.f32 %v1778_v39, %v1777_v38 }
 0x364   : > { %v1405_v26 = vsub.f32 0.0, %v1349_v25  ;;  %v1352_v41 = vadd.f32 %v1779_v40, %v2711_v18 }
 0x366   : > { %v1423_v42 = vmul.f32 1.442695, %v1405_v26  ;;  %v1406_v43 = vsub.f32 0.0, %v1352_v41  ;;  %v1780_v29 = vpop.f32.mrb[40].mxu0 }
 0x367   : > { %v1781_v44 = vpop.f32.mrb[41].mxu0 }
 0x368   : > { %2055 = vpow2.f32 %v1423_v42  ;;  %v1425_v45 = vmul.f32 1.442695, %v1406_v43  ;;  %v1782_v28 = vadd.f32 %v1781_v44, %v1780_v29  ;;  %v1783_v31 = vpop.f32.mrb[42].mxu0 }
 0x369   : > { %v1784_v46 = vpop.f32.mrb[43].mxu0 }
 0x36a   : > { %v2052_v47 = vpop.eup %2051  ;;  %2057 = vpow2.f32 %v1425_v45  ;;  %v1357_v48 = vadd.f32 %v1782_v28, %v2711_v18  ;;  %v1785_v49 = vadd.f32 %v1784_v46, %v1783_v31 }
 0x36b   : > { %v1451_v50 = vadd.f32 1.0, %v2052_v47 }
 0x36c   : > { %v2054_v51 = vpop.eup %2053  ;;  %v1407_v52 = vsub.f32 0.0, %v1357_v48  ;;  %v1360_v53 = vadd.f32 %v1785_v49, %v2711_v18 }
 0x36d   : > { %2059 = vrcp.f32 %v1451_v50  ;;  %v1452_v54 = vadd.f32 1.0, %v2054_v51 }
 0x36e   : > { %v1427_v55 = vmul.f32 1.442695, %v1407_v52  ;;  %v1408_v56 = vsub.f32 0.0, %v1360_v53  ;;  %v1786_v57 = vpop.f32.mrb[44].mxu0 }
 0x36f   : > { %2061 = vrcp.f32 %v1452_v54  ;;  %v1787_v58 = vpop.f32.mrb[45].mxu0 }
 0x370   : > { %2063 = vpow2.f32 %v1427_v55  ;;  %v1429_v59 = vmul.f32 1.442695, %v1408_v56  ;;  %v1788_v60 = vadd.f32 %v1787_v58, %v1786_v57  ;;  %v1789_v61 = vpop.f32.mrb[46].mxu0 }
 0x371   : > { %v1790_v62 = vpop.f32.mrb[47].mxu0 }
 0x372   : > { %v2056_v63 = vpop.eup %2055  ;;  %2065 = vpow2.f32 %v1429_v59  ;;  %v1365_v0 = vadd.f32 %v1788_v60, %v2711_v18  ;;  %v1791_v1 = vadd.f32 %v1790_v62, %v1789_v61 }
 0x373   : > { %v1453_v2 = vadd.f32 1.0, %v2056_v63 }
 0x374   : > { %v2058_v3 = vpop.eup %2057  ;;  %v1409_v4 = vsub.f32 0.0, %v1365_v0  ;;  %v1368_v5 = vadd.f32 %v1791_v1, %v2711_v18 }
 0x375   : > { %2067 = vrcp.f32 %v1453_v2  ;;  %v1454_v6 = vadd.f32 1.0, %v2058_v3 }
 0x376   : > { %v1431_v7 = vmul.f32 1.442695, %v1409_v4  ;;  %v1410_v8 = vsub.f32 0.0, %v1368_v5  ;;  %v1792_v9 = vpop.f32.mrb[32].mxu1 }
 0x377   : > { %v2060_v10 = vpop.eup %2059  ;;  %2069 = vrcp.f32 %v1454_v6  ;;  %v1793_v11 = vpop.f32.mrb[33].mxu1 }
 0x378   : > { %1499 = vst [vmem:[%s2723_s19] sm:$0xff] %v2060_v10  ;;  %2071 = vpow2.f32 %v1431_v7  ;;  %v1433_v12 = vmul.f32 1.442695, %v1410_v8  ;;  %v1794_v13 = vadd.f32 %v1793_v11, %v1792_v9  ;;  %v1795_v14 = vpop.f32.mrb[34].mxu1 }
 0x379   : > { %v2062_v15 = vpop.eup %2061  ;;  %v1796_v16 = vpop.f32.mrb[35].mxu1 }
 0x37a   : > { %v2064_v17 = vpop.eup %2063  ;;  %1500 = vst [vmem:[%s2723_s19 + $0x8] sm:$0xff] %v2062_v15  ;;  %2073 = vpow2.f32 %v1433_v12  ;;  %v1373_v19 = vadd.f32 %v1794_v13, %v2711_v18  ;;  %v1797_v34 = vadd.f32 %v1796_v16, %v1795_v14 }
 0x37b   : > { %v1455_v20 = vadd.f32 1.0, %v2064_v17 }
 0x37c   : > { %v2066_v21 = vpop.eup %2065  ;;  %v1411_v35 = vsub.f32 0.0, %v1373_v19  ;;  %v1376_v22 = vadd.f32 %v1797_v34, %v2711_v18 }
 0x37d   : > { %2075 = vrcp.f32 %v1455_v20  ;;  %v1456_v23 = vadd.f32 1.0, %v2066_v21 }
 0x37e   : > { %v1435_v27 = vmul.f32 1.442695, %v1411_v35  ;;  %v1412_v24 = vsub.f32 0.0, %v1376_v22  ;;  %v1798_v32 = vpop.f32.mrb[36].mxu1 }
 0x37f   : > { %v2068_v30 = vpop.eup %2067  ;;  %2077 = vrcp.f32 %v1456_v23  ;;  %v1799_v33 = vpop.f32.mrb[37].mxu1 }
 0x380   : > { %1501 = vst [vmem:[%s2723_s19 + $0x10] sm:$0xff] %v2068_v30  ;;  %2079 = vpow2.f32 %v1435_v27  ;;  %v1437_v36 = vmul.f32 1.442695, %v1412_v24  ;;  %v1800_v37 = vadd.f32 %v1799_v33, %v1798_v32  ;;  %v1801_v38 = vpop.f32.mrb[38].mxu1 }
 0x381   : > { %v2070_v39 = vpop.eup %2069  ;;  %v1802_v25 = vpop.f32.mrb[39].mxu1 }
 0x382   : > { %v2072_v40 = vpop.eup %2071  ;;  %1502 = vst [vmem:[%s2723_s19 + $0x18] sm:$0xff] %v2070_v39  ;;  %2081 = vpow2.f32 %v1437_v36  ;;  %v1381_v26 = vadd.f32 %v1800_v37, %v2711_v18  ;;  %v1803_v41 = vadd.f32 %v1802_v25, %v1801_v38 }
 0x383   : > { %v1457_v42 = vadd.f32 1.0, %v2072_v40 }
 0x384   : > { %v2074_v43 = vpop.eup %2073  ;;  %v1413_v29 = vsub.f32 0.0, %v1381_v26  ;;  %v1384_v44 = vadd.f32 %v1803_v41, %v2711_v18 }
 0x385   : > { %2083 = vrcp.f32 %v1457_v42  ;;  %v1458_v45 = vadd.f32 1.0, %v2074_v43 }
 0x386   : > { %v1439_v28 = vmul.f32 1.442695, %v1413_v29  ;;  %v1414_v31 = vsub.f32 0.0, %v1384_v44  ;;  %v1804_v46 = vpop.f32.mrb[40].mxu1 }
 0x387   : > { %v2076_v47 = vpop.eup %2075  ;;  %2085 = vrcp.f32 %v1458_v45  ;;  %v1805_v48 = vpop.f32.mrb[41].mxu1 }
 0x388   : > { %1503 = vst [vmem:[%s2723_s19 + $0x20] sm:$0xff] %v2076_v47  ;;  %2087 = vpow2.f32 %v1439_v28  ;;  %v1441_v49 = vmul.f32 1.442695, %v1414_v31  ;;  %v1806_v50 = vadd.f32 %v1805_v48, %v1804_v46  ;;  %v1807_v51 = vpop.f32.mrb[42].mxu1 }
 0x389   : > { %v2078_v52 = vpop.eup %2077  ;;  %v1808_v53 = vpop.f32.mrb[43].mxu1 }
 0x38a   : > { %v2080_v54 = vpop.eup %2079  ;;  %1504 = vst [vmem:[%s2723_s19 + $0x28] sm:$0xff] %v2078_v52  ;;  %2089 = vpow2.f32 %v1441_v49  ;;  %v1389_v55 = vadd.f32 %v1806_v50, %v2711_v18  ;;  %v1809_v56 = vadd.f32 %v1808_v53, %v1807_v51 }
 0x38b   : > { %v1459_v57 = vadd.f32 1.0, %v2080_v54 }
 0x38c   : > { %v2082_v58 = vpop.eup %2081  ;;  %v1415_v59 = vsub.f32 0.0, %v1389_v55  ;;  %v1392_v60 = vadd.f32 %v1809_v56, %v2711_v18 }
 0x38d   : > { %2091 = vrcp.f32 %v1459_v57  ;;  %v1460_v61 = vadd.f32 1.0, %v2082_v58 }
 0x38e   : > { %v1443_v62 = vmul.f32 1.442695, %v1415_v59  ;;  %v1416_v63 = vsub.f32 0.0, %v1392_v60  ;;  %v1810_v0 = vpop.f32.mrb[44].mxu1 }
 0x38f   : > { %v2084_v1 = vpop.eup %2083  ;;  %2093 = vrcp.f32 %v1460_v61  ;;  %v1811_v2 = vpop.f32.mrb[45].mxu1 }
 0x390   : > { %1505 = vst [vmem:[%s2723_s19 + $0x30] sm:$0xff] %v2084_v1  ;;  %2095 = vpow2.f32 %v1443_v62  ;;  %v1445_v3 = vmul.f32 1.442695, %v1416_v63  ;;  %v1812_v4 = vadd.f32 %v1811_v2, %v1810_v0  ;;  %v1813_v5 = vpop.f32.mrb[46].mxu1 }
 0x391   : > { %v2086_v6 = vpop.eup %2085  ;;  %v1814_v7 = vpop.f32.mrb[47].mxu1 }
 0x392   : > { %v2088_v8 = vpop.eup %2087  ;;  %1506 = vst [vmem:[%s2723_s19 + $0x38] sm:$0xff] %v2086_v6  ;;  %2097 = vpow2.f32 %v1445_v3  ;;  %v1397_v9 = vadd.f32 %v1812_v4, %v2711_v18  ;;  %v1815_v10 = vadd.f32 %v1814_v7, %v1813_v5 }
 0x393   : > { %v1461_v11 = vadd.f32 1.0, %v2088_v8 }
 0x394   : > { %v2090_v12 = vpop.eup %2089  ;;  %v1417_v13 = vsub.f32 0.0, %v1397_v9  ;;  %v1400_v14 = vadd.f32 %v1815_v10, %v2711_v18 }
 0x395   : > { %2099 = vrcp.f32 %v1461_v11  ;;  %v1462_v15 = vadd.f32 1.0, %v2090_v12 }
 0x396   : > { %v1447_v16 = vmul.f32 1.442695, %v1417_v13  ;;  %v1418_v17 = vsub.f32 0.0, %v1400_v14 }
 0x397   : > { %v2092_v19 = vpop.eup %2091  ;;  %2101 = vrcp.f32 %v1462_v15 }
 0x398   : > { %1507 = vst [vmem:[%s2723_s19 + $0x40] sm:$0xff] %v2092_v19  ;;  %2103 = vpow2.f32 %v1447_v16  ;;  %v1449_v34 = vmul.f32 1.442695, %v1418_v17 }
 0x399   : > { %v2094_v20 = vpop.eup %2093 }
 0x39a   : > { %v2096_v21 = vpop.eup %2095  ;;  %1508 = vst [vmem:[%s2723_s19 + $0x48] sm:$0xff] %v2094_v20  ;;  %2105 = vpow2.f32 %v1449_v34 }
 0x39b   : > { %v1463_v35 = vadd.f32 1.0, %v2096_v21 }
 0x39c   : > { %v2098_v22 = vpop.eup %2097 }
 0x39d   : > { %2107 = vrcp.f32 %v1463_v35  ;;  %v1464_v18 = vadd.f32 1.0, %v2098_v22 }
 0x39f   : > { %v2100_v23 = vpop.eup %2099  ;;  %2109 = vrcp.f32 %v1464_v18 }
 0x3a0   : > { %1509 = vst [vmem:[%s2723_s19 + $0x50] sm:$0xff] %v2100_v23 }
 0x3a1   : > { %v2102_v27 = vpop.eup %2101 }
 0x3a2   : > { %v2104_v24 = vpop.eup %2103  ;;  %1510 = vst [vmem:[%s2723_s19 + $0x58] sm:$0xff] %v2102_v27 }
 0x3a3   : > { %v1465_v32 = vadd.f32 1.0, %v2104_v24 }
 0x3a4   : > { %v2106_v30 = vpop.eup %2105 }
 0x3a5   : > { %2111 = vrcp.f32 %v1465_v32  ;;  %v1466_v33 = vadd.f32 1.0, %v2106_v30 }
 0x3a7   : > { %v2108_v36 = vpop.eup %2107  ;;  %2113 = vrcp.f32 %v1466_v33 }
 0x3a8   : > { %1511 = vst [vmem:[%s2723_s19 + $0x60] sm:$0xff] %v2108_v36 }
 0x3a9   : > { %v2110_v37 = vpop.eup %2109 }
 0x3aa   : > { %1512 = vst [vmem:[%s2723_s19 + $0x68] sm:$0xff] %v2110_v37 }
 0x3af   : > { %v2112_v38 = vpop.eup %2111 }
 0x3b0   : > { %1513 = vst [vmem:[%s2723_s19 + $0x70] sm:$0xff] %v2112_v38 }
 0x3b1   : > { %v2114_v39 = vpop.eup %2113 }
 0x3b2   : > { %1514 = vst [vmem:[%s2723_s19 + $0x78] sm:$0xff] %v2114_v39 }
 0x3b3   : > { %2242 = shalt.err (!%p2239_p4)
}
 0x3b4   : > { %s2243_s13 = scalar_lea.hbm %s2752_s10, 2048  ;;  %s2247_s8 = scalar_lea.hbm %s2807_s7, 4096 }
 0x3b5   : > { %p2244_p9 = scmp.ne.s32.totalorder %s2752_s10, %s2243_s13  ;;  %p2248_p8 = scmp.lt.u32.totalorder %s2752_s10, %s2807_s7 }
 0x3b6   : > { %p2249_p13 = scmp.lt.u32.totalorder %s2247_s8, %s2243_s13  ;;  %p2251_p10 = scmp.lt.u32.totalorder %s2243_s13, %s2752_s10 }
 0x3b7   : > { %p2245_p0 = pnand %p2244_p9, %p2507_p5 }
 0x3b8   : > { %p2250_p6 = por %p2249_p13, %p2248_p8 }
 0x3b9   : > { %p2246_p11 = pneg %p2245_p0 }
 0x3ba   : > { %p2252_p3 = por %p2251_p10, %p2250_p6 }
 0x3bc   : > { %p2253_p7 = pnand %p2252_p3, %p2246_p11 }
 0x3be   : > { %2256 = shalt.err (!%p2253_p7)
}
 0x3bf   : > { %s2314_s16 = smov 128   ;;  %s2315_s11 = smov 8  }
 0x3c0   : > { %1846 = dma.vmem_to_hbm [thread:$0]  (%p2507_p5), %s2754_s29, 2048, %s2752_s10, %s1516_s22, %s2314_s16, %s2314_s16, %s2315_s11  }
 0x3c1 PF: > { %s2827_s17 = sld [smem:[#allocation15_spill]]  ;;  %s1544_s28 = sand.u32 1, %s2291_s24  }
 0x3c2   : > { %p2829_p1 = scmp.ge.s32.totalorder %s2303_s27, 2  ;;  %s1545_s30 = scalar_lea.sflag [#allocation4], %s1544_s28 }
 0x3c7   : > { %p2828_p12 = scmp.ne.s32.totalorder %s2827_s17, 0 }
 0x3c9   : > { %p1863_p2 = pnand %p2829_p1, %p2828_p12 }
 0x3cb   : > { %2286 = dma.done.wait (!%p1863_p2), %s1545_s30, 2048  }
 0x3cc   : > { %2288 = vsyncadd (!%p1863_p2), %s1545_s30, 4294965248  ;;  %p22_p4 = scmp.ge.s32.totalorder %s2493_s18, 4   ;;  %s2830_s24 = smov %s2295_s25 }
 0x3cd   : > { %s2831_s25 = smov %s2299_s26  ;;  %s2832_s26 = smov %s2503_s21 }
 0x3ce   : > { %s2833_s27 = smov %s2493_s18  ;;  %24 = sbr.rel (!%p22_p4) target bundleno = 7 (0x7), region = 105 }
 0x3d5   :  { %1550 = vsyncpa [#allocation3], 1 }
 0x3d6   :  { %1552 = vsyncpa [#allocation3 + $0x1], 1 }
 0x3d7   :  { %1553 = vsyncpa [#allocation6], 1 }
 0x3d8   :  { %1554 = vsyncpa [#allocation9], 1 }
 0x3d9   :  { %1555 = vsyncpa [#allocation4], 1 }
 0x3da   :  { %1557 = vsyncpa [#allocation4 + $0x1], 1 }

</bundles_post_ra>
